<compile_context>
chip_gen: v7x
topology: tpu7x:2x2x1
jax: 0.10.0
libtpu: 0.0.40
codegen_flags: <defaults>
</compile_context>

<pallas_src>
import functools

import numpy as np
import jax
import jax.numpy as jnp
from jax.experimental import pallas as pl
from jax.experimental.pallas import tpu as pltpu

EPS = 1e-5


# ----------------------------- in-kernel helpers ---------------------------- #

def _build_patches(v, mask_rows, W, pad_w):
    """(C, Mp) activation -> (9*C, Mp) im2col patch matrix, entirely in VMEM.

    Tap (dy, dx) of a padded 3x3 conv is a lane shift of the flattened (n, h, w) pixel
    axis by dy*W + dx; pixels whose shifted read would cross an image/row boundary (or
    land in the lane-padding columns) are zeroed by the precomputed masks.  The zero halo
    is lane-aligned (pad_w is a multiple of 128), so tap offsets are static.
    """
    C, Mp = v.shape
    zpad = jnp.zeros((C, pad_w), v.dtype)
    vp = jnp.concatenate([zpad, v, zpad], axis=1)          # (C, Mp + 2*pad_w)
    taps = []
    t = 0
    for dy in (-1, 0, 1):
        for dx in (-1, 0, 1):
            start = pad_w + dy * W + dx                    # static offset
            taps.append(vp[:, start:start + Mp] * mask_rows[t])
            t += 1
    return jnp.concatenate(taps, axis=0)                   # (9*C, Mp)


def _bn_scale_shift(a, g, b, inv_count):
    """Training-mode BatchNorm folded to y = a*scale + shift (single-pass stats, f32).

    `a` is zero in the lane-padding columns, so plain sums over the padded lane axis are
    exact as long as we divide by the true pixel count (inv_count = 1/(N*H*W), static).
    """
    mean = jnp.sum(a, axis=1, keepdims=True) * inv_count            # (P, 1)
    ex2 = jnp.sum(a * a, axis=1, keepdims=True) * inv_count         # (P, 1)
    # One-pass variance; clamp guards against tiny negative values from cancellation.
    var = jnp.maximum(ex2 - mean * mean, 0.0)
    scale = g * jax.lax.rsqrt(var + EPS)
    shift = b - mean * scale
    return scale, shift


# --------------------------------- kernel ----------------------------------- #

def _fused_block_kernel(x_ref, masks_ref, w1_ref, w2_ref, g1_ref, b1_ref,
                        g2_ref, b2_ref, o_ref, *, W, pad_w, inv_count):
    x = x_ref[...]                                          # (C, Mp) f32 (also the residual)
    mask_rows = [masks_ref[t:t + 1, :] for t in range(9)]   # each (1, Mp) f32
    mm_dtype = w1_ref.dtype                                 # f32, or bf16 on v6e/v7x path

    # conv1 as ONE K=9*Cin MXU matmul (conv bias dropped: train-mode BN cancels it exactly)
    p1 = _build_patches(x, mask_rows, W, pad_w).astype(mm_dtype)          # (9*C, Mp)
    a1 = jnp.dot(w1_ref[...], p1, preferred_element_type=jnp.float32)     # (P, Mp) f32
    s1, t1 = _bn_scale_shift(a1, g1_ref[...], b1_ref[...], inv_count)
    y1 = jnp.maximum(a1 * s1 + t1, 0.0)                                   # ReLU, stays in VMEM

    # conv2 + BN2 + residual add + ReLU (y1 never touches HBM)
    p2 = _build_patches(y1, mask_rows, W, pad_w).astype(mm_dtype)         # (9*P, Mp)
    a2 = jnp.dot(w2_ref[...], p2, preferred_element_type=jnp.float32)     # (P, Mp) f32
    s2, t2 = _bn_scale_shift(a2, g2_ref[...], b2_ref[...], inv_count)
    o_ref[...] = jnp.maximum(a2 * s2 + t2 + x, 0.0)                       # lane-dense store


# ------------------------------ glue / wrapper ------------------------------ #

def _boundary_masks(N, H, W, M_pad):
    """(9, M_pad) 0/1 masks; tap order (dy in -1,0,1) major, (dx in -1,0,1) minor.

    Columns beyond N*H*W (lane padding) are zero for every tap, so they stay zero through
    both convs and contribute nothing to the BN sums.
    """
    M = N * H * W
    m = np.arange(M)
    h = (m // W) % H
    w = m % W
    rows = []
    for dy in (-1, 0, 1):
        for dx in (-1, 0, 1):
            ok = (h + dy >= 0) & (h + dy < H) & (w + dx >= 0) & (w + dx < W)
            row = np.zeros((M_pad,), np.float32)
            row[:M] = ok.astype(np.float32)
            rows.append(row)
    return np.stack(rows, axis=0)


def _w_as_matrix(w_oihw):
    """(Cout, Cin, 3, 3) -> (Cout, 9*Cin); column block t = (dy+1)*3+(dx+1) holds tap t."""
    cout, cin = w_oihw.shape[0], w_oihw.shape[1]
    return jnp.transpose(w_oihw, (0, 2, 3, 1)).reshape(cout, 9 * cin)


@functools.partial(jax.jit, static_argnames=("matmul_dtype",))
def sl_baseblock_forward(x_nchw, params, *, matmul_dtype=jnp.float32):
    """Forward of SL_Baseblock with stride=1, downsample=None (input_planes == planes)."""
    N, C, H, W = x_nchw.shape
    P = params["conv1_w"].shape[0]
    if C != P:
        raise NotImplementedError("requires input_planes == planes (downsample=None path)")
    M = N * H * W
    M_pad = pl.cdiv(M, 128) * 128              # lane-dense pixel axis for any (N, H, W)
    pad_w = pl.cdiv(W + 1, 128) * 128          # lane-aligned halo for in-kernel tap shifts

    # NCHW -> (C, M) with pixels (n, h, w) on the lane axis; zero-pad lanes to M_pad.
    x_cm = jnp.transpose(x_nchw, (1, 0, 2, 3)).reshape(C, M).astype(jnp.float32)
    x_cm = jnp.pad(x_cm, ((0, 0), (0, M_pad - M)))
    masks = jnp.asarray(_boundary_masks(N, H, W, M_pad))
    w1 = _w_as_matrix(params["conv1_w"]).astype(matmul_dtype)
    w2 = _w_as_matrix(params["conv2_w"]).astype(matmul_dtype)
    g1 = params["bn1_g"].reshape(P, 1).astype(jnp.float32)
    b1 = params["bn1_b"].reshape(P, 1).astype(jnp.float32)
    g2 = params["bn2_g"].reshape(P, 1).astype(jnp.float32)
    b2 = params["bn2_b"].reshape(P, 1).astype(jnp.float32)
    # NOTE: conv biases are intentionally not passed -- training-mode BN subtracts the
    # batch mean, which absorbs a constant per-channel bias exactly.

    kernel = functools.partial(_fused_block_kernel, W=W, pad_w=pad_w,
                               inv_count=float(1.0 / M))
    out_pm = pl.pallas_call(
        kernel,
        out_shape=jax.ShapeDtypeStruct((P, M_pad), jnp.float32),
        in_specs=[pl.BlockSpec(memory_space=pltpu.MemorySpace.VMEM) for _ in range(8)],
        out_specs=pl.BlockSpec(memory_space=pltpu.MemorySpace.VMEM),
    )(x_cm, masks, w1, w2, g1, b1, g2, b2)

    # (P, M_pad) -> drop lane padding -> NCHW
    return jnp.transpose(out_pm[:, :M].reshape(P, N, H, W), (1, 0, 2, 3))


# ------------------------------ reference (pure JAX) ------------------------ #

def _ref_forward(x_nchw, params):
    def conv(x, w, b):
        y = jax.lax.conv_general_dilated(
            x, w, window_strides=(1, 1), padding="SAME",
            dimension_numbers=("NCHW", "OIHW", "NCHW"))
        return y + b[None, :, None, None]

    def bn(y, g, be):
        mean = jnp.mean(y, axis=(0, 2, 3), keepdims=True)
        var = jnp.mean(jnp.square(y - mean), axis=(0, 2, 3), keepdims=True)
        return (y - mean) * jax.lax.rsqrt(var + EPS) * g[None, :, None, None] \
            + be[None, :, None, None]

    o = jax.nn.relu(bn(conv(x_nchw, params["conv1_w"], params["conv1_b"]),
                       params["bn1_g"], params["bn1_b"]))
    o = bn(conv(o, params["conv2_w"], params["conv2_b"]), params["bn2_g"], params["bn2_b"])
    return jax.nn.relu(o + x_nchw)


# ----------------------------------- main ----------------------------------- #

if __name__ == "__main__":
    N, C, H, W = 2, 8, 16, 16      # input_planes = planes = 8, stride = 1, downsample = None
    planes = C

    key = jax.random.PRNGKey(0)
    ks = jax.random.split(key, 9)
    fan_in = C * 9
    params = {
        "conv1_w": jax.random.normal(ks[0], (planes, C, 3, 3), jnp.float32) / jnp.sqrt(fan_in),
        "conv1_b": 0.1 * jax.random.normal(ks[1], (planes,), jnp.float32),
        "bn1_g":   1.0 + 0.1 * jax.random.normal(ks[2], (planes,), jnp.float32),
        "bn1_b":   0.1 * jax.random.normal(ks[3], (planes,), jnp.float32),
        "conv2_w": jax.random.normal(ks[4], (planes, planes, 3, 3), jnp.float32) / jnp.sqrt(planes * 9),
        "conv2_b": 0.1 * jax.random.normal(ks[5], (planes,), jnp.float32),
        "bn2_g":   1.0 + 0.1 * jax.random.normal(ks[6], (planes,), jnp.float32),
        "bn2_b":   0.1 * jax.random.normal(ks[7], (planes,), jnp.float32),
    }
    x = jax.random.normal(ks[8], (N, C, H, W), jnp.float32)

    ref = jax.block_until_ready(_ref_forward(x, params))

    # f32 MXU path (default): tight check (tolerance allows accumulation-order differences).
    out = jax.block_until_ready(sl_baseblock_forward(x, params))
    assert out.shape == (N, planes, H, W), out.shape
    assert jnp.allclose(out, ref, atol=1e-3, rtol=1e-3), float(jnp.max(jnp.abs(out - ref)))

    # bf16 matmul path (v6e/v7x recommendation): operands bf16, stats/residual in f32.
    out_bf16 = jax.block_until_ready(
        sl_baseblock_forward(x, params, matmul_dtype=jnp.bfloat16))
    assert jnp.allclose(out_bf16, ref, atol=1e-1, rtol=1e-1), \
        float(jnp.max(jnp.abs(out_bf16 - ref)))

    print("KERNEL_OK")
</pallas_src>

<mosaic_0001>
module attributes {stable_mosaic.version = 11 : i64} {
  func.func @_fused_block_kernel(%arg0: memref<8x512xf32, #tpu.memory_space<vmem>>, %arg1: memref<9x512xf32, #tpu.memory_space<vmem>>, %arg2: memref<8x72xf32, #tpu.memory_space<vmem>>, %arg3: memref<8x72xf32, #tpu.memory_space<vmem>>, %arg4: memref<8x1xf32, #tpu.memory_space<vmem>>, %arg5: memref<8x1xf32, #tpu.memory_space<vmem>>, %arg6: memref<8x1xf32, #tpu.memory_space<vmem>>, %arg7: memref<8x1xf32, #tpu.memory_space<vmem>>, %arg8: memref<8x512xf32, #tpu.memory_space<vmem>>) attributes {dimension_semantics = [], scalar_prefetch = 0 : i64, scratch_operands = 0 : i64, tpu.core_type = #tpu.core_type<tc>} {
    %c0 = arith.constant 0 : index
    %c0_0 = arith.constant 0 : index
    %0 = vector.load %arg0[%c0, %c0_0] : memref<8x512xf32, #tpu.memory_space<vmem>>, vector<8x512xf32>
    %c0_1 = arith.constant 0 : index
    %c0_2 = arith.constant 0 : index
    %1 = vector.load %arg1[%c0_1, %c0_2] : memref<9x512xf32, #tpu.memory_space<vmem>>, vector<1x512xf32>
    %c1 = arith.constant 1 : index
    %c0_3 = arith.constant 0 : index
    %2 = vector.load %arg1[%c1, %c0_3] : memref<9x512xf32, #tpu.memory_space<vmem>>, vector<1x512xf32>
    %c2 = arith.constant 2 : index
    %c0_4 = arith.constant 0 : index
    %3 = vector.load %arg1[%c2, %c0_4] : memref<9x512xf32, #tpu.memory_space<vmem>>, vector<1x512xf32>
    %c3 = arith.constant 3 : index
    %c0_5 = arith.constant 0 : index
    %4 = vector.load %arg1[%c3, %c0_5] : memref<9x512xf32, #tpu.memory_space<vmem>>, vector<1x512xf32>
    %c4 = arith.constant 4 : index
    %c0_6 = arith.constant 0 : index
    %5 = vector.load %arg1[%c4, %c0_6] : memref<9x512xf32, #tpu.memory_space<vmem>>, vector<1x512xf32>
    %c5 = arith.constant 5 : index
    %c0_7 = arith.constant 0 : index
    %6 = vector.load %arg1[%c5, %c0_7] : memref<9x512xf32, #tpu.memory_space<vmem>>, vector<1x512xf32>
    %c6 = arith.constant 6 : index
    %c0_8 = arith.constant 0 : index
    %7 = vector.load %arg1[%c6, %c0_8] : memref<9x512xf32, #tpu.memory_space<vmem>>, vector<1x512xf32>
    %c7 = arith.constant 7 : index
    %c0_9 = arith.constant 0 : index
    %8 = vector.load %arg1[%c7, %c0_9] : memref<9x512xf32, #tpu.memory_space<vmem>>, vector<1x512xf32>
    %c8 = arith.constant 8 : index
    %c0_10 = arith.constant 0 : index
    %9 = vector.load %arg1[%c8, %c0_10] : memref<9x512xf32, #tpu.memory_space<vmem>>, vector<1x512xf32>
    %cst = arith.constant 0.000000e+00 : f32
    %10 = vector.broadcast %cst : f32 to vector<8x128xf32>
    %11 = tpu.concatenate %10, %0, %10 in 1 : vector<8x128xf32>, vector<8x512xf32>, vector<8x128xf32> -> vector<8x768xf32>
    %12 = vector.extract_strided_slice %11 {offsets = [0, 111], sizes = [8, 512], strides = [1, 1]} : vector<8x768xf32> to vector<8x512xf32>
    %13 = vector.broadcast %1 : vector<1x512xf32> to vector<8x512xf32>
    %14 = arith.mulf %12, %13 : vector<8x512xf32>
    %15 = vector.extract_strided_slice %11 {offsets = [0, 112], sizes = [8, 512], strides = [1, 1]} : vector<8x768xf32> to vector<8x512xf32>
    %16 = vector.broadcast %2 : vector<1x512xf32> to vector<8x512xf32>
    %17 = arith.mulf %15, %16 : vector<8x512xf32>
    %18 = vector.extract_strided_slice %11 {offsets = [0, 113], sizes = [8, 512], strides = [1, 1]} : vector<8x768xf32> to vector<8x512xf32>
    %19 = vector.broadcast %3 : vector<1x512xf32> to vector<8x512xf32>
    %20 = arith.mulf %18, %19 : vector<8x512xf32>
    %21 = vector.extract_strided_slice %11 {offsets = [0, 127], sizes = [8, 512], strides = [1, 1]} : vector<8x768xf32> to vector<8x512xf32>
    %22 = vector.broadcast %4 : vector<1x512xf32> to vector<8x512xf32>
    %23 = arith.mulf %21, %22 : vector<8x512xf32>
    %24 = vector.extract_strided_slice %11 {offsets = [0, 128], sizes = [8, 512], strides = [1, 1]} : vector<8x768xf32> to vector<8x512xf32>
    %25 = vector.broadcast %5 : vector<1x512xf32> to vector<8x512xf32>
    %26 = arith.mulf %24, %25 : vector<8x512xf32>
    %27 = vector.extract_strided_slice %11 {offsets = [0, 129], sizes = [8, 512], strides = [1, 1]} : vector<8x768xf32> to vector<8x512xf32>
    %28 = vector.broadcast %6 : vector<1x512xf32> to vector<8x512xf32>
    %29 = arith.mulf %27, %28 : vector<8x512xf32>
    %30 = vector.extract_strided_slice %11 {offsets = [0, 143], sizes = [8, 512], strides = [1, 1]} : vector<8x768xf32> to vector<8x512xf32>
    %31 = vector.broadcast %7 : vector<1x512xf32> to vector<8x512xf32>
    %32 = arith.mulf %30, %31 : vector<8x512xf32>
    %33 = vector.extract_strided_slice %11 {offsets = [0, 144], sizes = [8, 512], strides = [1, 1]} : vector<8x768xf32> to vector<8x512xf32>
    %34 = vector.broadcast %8 : vector<1x512xf32> to vector<8x512xf32>
    %35 = arith.mulf %33, %34 : vector<8x512xf32>
    %36 = vector.extract_strided_slice %11 {offsets = [0, 145], sizes = [8, 512], strides = [1, 1]} : vector<8x768xf32> to vector<8x512xf32>
    %37 = vector.broadcast %9 : vector<1x512xf32> to vector<8x512xf32>
    %38 = arith.mulf %36, %37 : vector<8x512xf32>
    %39 = tpu.concatenate %14, %17, %20, %23, %26, %29, %32, %35, %38 in 0 : vector<8x512xf32>, vector<8x512xf32>, vector<8x512xf32>, vector<8x512xf32>, vector<8x512xf32>, vector<8x512xf32>, vector<8x512xf32>, vector<8x512xf32>, vector<8x512xf32> -> vector<72x512xf32>
    %c0_11 = arith.constant 0 : index
    %c0_12 = arith.constant 0 : index
    %40 = vector.load %arg2[%c0_11, %c0_12] : memref<8x72xf32, #tpu.memory_space<vmem>>, vector<8x72xf32>
    %cst_13 = arith.constant dense<0.000000e+00> : vector<8x512xf32>
    %41 = tpu.matmul %40, %39, %cst_13 {dimension_numbers = #tpu.dot_dimension_numbers<[1], [0], [0], [1], [0, 0, 1, 1], [], []>} : vector<8x72xf32>, vector<72x512xf32>, vector<8x512xf32> -> vector<8x512xf32>
    %c0_14 = arith.constant 0 : index
    %c0_15 = arith.constant 0 : index
    %42 = vector.load %arg4[%c0_14, %c0_15] : memref<8x1xf32, #tpu.memory_space<vmem>>, vector<8x1xf32>
    %c0_16 = arith.constant 0 : index
    %c0_17 = arith.constant 0 : index
    %43 = vector.load %arg5[%c0_16, %c0_17] : memref<8x1xf32, #tpu.memory_space<vmem>>, vector<8x1xf32>
    %cst_18 = arith.constant dense<0.000000e+00> : vector<8xf32>
    %44 = vector.multi_reduction <add>, %41, %cst_18 [1] : vector<8x512xf32> to vector<8xf32>
    %45 = vector.shape_cast %44 : vector<8xf32> to vector<8x1xf32>
    %cst_19 = arith.constant 0.001953125 : f32
    %46 = vector.broadcast %cst_19 : f32 to vector<8x1xf32>
    %47 = arith.mulf %45, %46 : vector<8x1xf32>
    %48 = arith.mulf %41, %41 : vector<8x512xf32>
    %cst_20 = arith.constant dense<0.000000e+00> : vector<8xf32>
    %49 = vector.multi_reduction <add>, %48, %cst_20 [1] : vector<8x512xf32> to vector<8xf32>
    %50 = vector.shape_cast %49 : vector<8xf32> to vector<8x1xf32>
    %cst_21 = arith.constant 0.001953125 : f32
    %51 = vector.broadcast %cst_21 : f32 to vector<8x1xf32>
    %52 = arith.mulf %50, %51 : vector<8x1xf32>
    %53 = arith.mulf %47, %47 : vector<8x1xf32>
    %54 = arith.subf %52, %53 : vector<8x1xf32>
    %cst_22 = arith.constant 0.000000e+00 : f32
    %55 = vector.broadcast %cst_22 : f32 to vector<8x1xf32>
    %56 = arith.maximumf %54, %55 : vector<8x1xf32>
    %cst_23 = arith.constant 9.99999974E-6 : f32
    %57 = vector.broadcast %cst_23 : f32 to vector<8x1xf32>
    %58 = arith.addf %56, %57 : vector<8x1xf32>
    %59 = math.rsqrt %58 : vector<8x1xf32>
    %60 = arith.mulf %42, %59 : vector<8x1xf32>
    %61 = arith.mulf %47, %60 : vector<8x1xf32>
    %62 = arith.subf %43, %61 : vector<8x1xf32>
    %63 = vector.broadcast %60 : vector<8x1xf32> to vector<8x512xf32>
    %64 = arith.mulf %41, %63 : vector<8x512xf32>
    %65 = vector.broadcast %62 : vector<8x1xf32> to vector<8x512xf32>
    %66 = arith.addf %64, %65 : vector<8x512xf32>
    %cst_24 = arith.constant 0.000000e+00 : f32
    %67 = vector.broadcast %cst_24 : f32 to vector<8x512xf32>
    %68 = arith.maximumf %66, %67 : vector<8x512xf32>
    %cst_25 = arith.constant 0.000000e+00 : f32
    %69 = vector.broadcast %cst_25 : f32 to vector<8x128xf32>
    %70 = tpu.concatenate %69, %68, %69 in 1 : vector<8x128xf32>, vector<8x512xf32>, vector<8x128xf32> -> vector<8x768xf32>
    %71 = vector.extract_strided_slice %70 {offsets = [0, 111], sizes = [8, 512], strides = [1, 1]} : vector<8x768xf32> to vector<8x512xf32>
    %72 = vector.broadcast %1 : vector<1x512xf32> to vector<8x512xf32>
    %73 = arith.mulf %71, %72 : vector<8x512xf32>
    %74 = vector.extract_strided_slice %70 {offsets = [0, 112], sizes = [8, 512], strides = [1, 1]} : vector<8x768xf32> to vector<8x512xf32>
    %75 = vector.broadcast %2 : vector<1x512xf32> to vector<8x512xf32>
    %76 = arith.mulf %74, %75 : vector<8x512xf32>
    %77 = vector.extract_strided_slice %70 {offsets = [0, 113], sizes = [8, 512], strides = [1, 1]} : vector<8x768xf32> to vector<8x512xf32>
    %78 = vector.broadcast %3 : vector<1x512xf32> to vector<8x512xf32>
    %79 = arith.mulf %77, %78 : vector<8x512xf32>
    %80 = vector.extract_strided_slice %70 {offsets = [0, 127], sizes = [8, 512], strides = [1, 1]} : vector<8x768xf32> to vector<8x512xf32>
    %81 = vector.broadcast %4 : vector<1x512xf32> to vector<8x512xf32>
    %82 = arith.mulf %80, %81 : vector<8x512xf32>
    %83 = vector.extract_strided_slice %70 {offsets = [0, 128], sizes = [8, 512], strides = [1, 1]} : vector<8x768xf32> to vector<8x512xf32>
    %84 = vector.broadcast %5 : vector<1x512xf32> to vector<8x512xf32>
    %85 = arith.mulf %83, %84 : vector<8x512xf32>
    %86 = vector.extract_strided_slice %70 {offsets = [0, 129], sizes = [8, 512], strides = [1, 1]} : vector<8x768xf32> to vector<8x512xf32>
    %87 = vector.broadcast %6 : vector<1x512xf32> to vector<8x512xf32>
    %88 = arith.mulf %86, %87 : vector<8x512xf32>
    %89 = vector.extract_strided_slice %70 {offsets = [0, 143], sizes = [8, 512], strides = [1, 1]} : vector<8x768xf32> to vector<8x512xf32>
    %90 = vector.broadcast %7 : vector<1x512xf32> to vector<8x512xf32>
    %91 = arith.mulf %89, %90 : vector<8x512xf32>
    %92 = vector.extract_strided_slice %70 {offsets = [0, 144], sizes = [8, 512], strides = [1, 1]} : vector<8x768xf32> to vector<8x512xf32>
    %93 = vector.broadcast %8 : vector<1x512xf32> to vector<8x512xf32>
    %94 = arith.mulf %92, %93 : vector<8x512xf32>
    %95 = vector.extract_strided_slice %70 {offsets = [0, 145], sizes = [8, 512], strides = [1, 1]} : vector<8x768xf32> to vector<8x512xf32>
    %96 = vector.broadcast %9 : vector<1x512xf32> to vector<8x512xf32>
    %97 = arith.mulf %95, %96 : vector<8x512xf32>
    %98 = tpu.concatenate %73, %76, %79, %82, %85, %88, %91, %94, %97 in 0 : vector<8x512xf32>, vector<8x512xf32>, vector<8x512xf32>, vector<8x512xf32>, vector<8x512xf32>, vector<8x512xf32>, vector<8x512xf32>, vector<8x512xf32>, vector<8x512xf32> -> vector<72x512xf32>
    %c0_26 = arith.constant 0 : index
    %c0_27 = arith.constant 0 : index
    %99 = vector.load %arg3[%c0_26, %c0_27] : memref<8x72xf32, #tpu.memory_space<vmem>>, vector<8x72xf32>
    %cst_28 = arith.constant dense<0.000000e+00> : vector<8x512xf32>
    %100 = tpu.matmul %99, %98, %cst_28 {dimension_numbers = #tpu.dot_dimension_numbers<[1], [0], [0], [1], [0, 0, 1, 1], [], []>} : vector<8x72xf32>, vector<72x512xf32>, vector<8x512xf32> -> vector<8x512xf32>
    %c0_29 = arith.constant 0 : index
    %c0_30 = arith.constant 0 : index
    %101 = vector.load %arg6[%c0_29, %c0_30] : memref<8x1xf32, #tpu.memory_space<vmem>>, vector<8x1xf32>
    %c0_31 = arith.constant 0 : index
    %c0_32 = arith.constant 0 : index
    %102 = vector.load %arg7[%c0_31, %c0_32] : memref<8x1xf32, #tpu.memory_space<vmem>>, vector<8x1xf32>
    %cst_33 = arith.constant dense<0.000000e+00> : vector<8xf32>
    %103 = vector.multi_reduction <add>, %100, %cst_33 [1] : vector<8x512xf32> to vector<8xf32>
    %104 = vector.shape_cast %103 : vector<8xf32> to vector<8x1xf32>
    %cst_34 = arith.constant 0.001953125 : f32
    %105 = vector.broadcast %cst_34 : f32 to vector<8x1xf32>
    %106 = arith.mulf %104, %105 : vector<8x1xf32>
    %107 = arith.mulf %100, %100 : vector<8x512xf32>
    %cst_35 = arith.constant dense<0.000000e+00> : vector<8xf32>
    %108 = vector.multi_reduction <add>, %107, %cst_35 [1] : vector<8x512xf32> to vector<8xf32>
    %109 = vector.shape_cast %108 : vector<8xf32> to vector<8x1xf32>
    %cst_36 = arith.constant 0.001953125 : f32
    %110 = vector.broadcast %cst_36 : f32 to vector<8x1xf32>
    %111 = arith.mulf %109, %110 : vector<8x1xf32>
    %112 = arith.mulf %106, %106 : vector<8x1xf32>
    %113 = arith.subf %111, %112 : vector<8x1xf32>
    %cst_37 = arith.constant 0.000000e+00 : f32
    %114 = vector.broadcast %cst_37 : f32 to vector<8x1xf32>
    %115 = arith.maximumf %113, %114 : vector<8x1xf32>
    %cst_38 = arith.constant 9.99999974E-6 : f32
    %116 = vector.broadcast %cst_38 : f32 to vector<8x1xf32>
    %117 = arith.addf %115, %116 : vector<8x1xf32>
    %118 = math.rsqrt %117 : vector<8x1xf32>
    %119 = arith.mulf %101, %118 : vector<8x1xf32>
    %120 = arith.mulf %106, %119 : vector<8x1xf32>
    %121 = arith.subf %102, %120 : vector<8x1xf32>
    %122 = vector.broadcast %119 : vector<8x1xf32> to vector<8x512xf32>
    %123 = arith.mulf %100, %122 : vector<8x512xf32>
    %124 = vector.broadcast %121 : vector<8x1xf32> to vector<8x512xf32>
    %125 = arith.addf %123, %124 : vector<8x512xf32>
    %126 = arith.addf %125, %0 : vector<8x512xf32>
    %cst_39 = arith.constant 0.000000e+00 : f32
    %127 = vector.broadcast %cst_39 : f32 to vector<8x512xf32>
    %128 = arith.maximumf %126, %127 : vector<8x512xf32>
    %c0_40 = arith.constant 0 : index
    %c0_41 = arith.constant 0 : index
    %129 = vector.load %arg8[%c0_40, %c0_41] : memref<8x512xf32, #tpu.memory_space<vmem>>, vector<8x512xf32>
    tpu.vector_store %arg8[%c0_40, %c0_41], %128 {strides = array<i32>} : memref<8x512xf32, #tpu.memory_space<vmem>>, vector<8x512xf32>,
    return
  }
}

</mosaic_0001>

<bundles_post_ra>
// kernel: sl_baseblock_forward.1
= control target key start
LH: loop header
LB: loop body
LE: loop exit
PB: predicated region body
PF: predicated region fallthrough
CT: control target
= control target key end

     0   :  { %v51_v0 = vlaneseq  ;;  %s1871_s29 = smov 112   ;;  %s1872_s10 = smov 113   ;;  %vm114_vm0 = vcmask 916480   ;;  %vm153_vm1 = vcmask 924672   ;;  %vm192_vm2 = vcmask 1039360   ;;  %s2730_s1 = inlined_call_operand.vmem [shape: f32[9,512], index: 1, kind: input, shape index: {}]   ;;  %s2731_s0 = inlined_call_operand.vmem [shape: f32[8,512], index: 0, kind: input, shape index: {}]   ;;  %s2732_s2 = inlined_call_operand.vmem [shape: f32[8,72], index: 2, kind: input, shape index: {}]   ;;  %s2733_s4 = inlined_call_operand.vmem [shape: f32[8,1], index: 4, kind: input, shape index: {}]   ;;  %s2734_s5 = inlined_call_operand.vmem [shape: f32[8,1], index: 5, kind: input, shape index: {}]   ;;  %s2735_s3 = inlined_call_operand.vmem [shape: f32[8,72], index: 3, kind: input, shape index: {}]   ;;  %s2736_s6 = inlined_call_operand.vmem [shape: f32[8,1], index: 6, kind: input, shape index: {}]   ;;  %s2737_s7 = inlined_call_operand.vmem [shape: f32[8,1], index: 7, kind: input, shape index: {}]   ;;  %s2738_s8 = inlined_call_operand.vmem [shape: f32[8,512], index: 8, kind: output, shape index: {}]  }
   0x1   :  { %v1435_v2 = vld [vmem:[%s2730_s1 + $0x1] ss:$8 sm:$0xf]  ;;  %v1436_v11 = vld [vmem:[%s2730_s1 + $0x2] ss:$8 sm:$0xf] }
   0x2   :  { %v52_v1 = vshrl.u32 %v51_v0, 7  ;;  %v1437_v16 = vld [vmem:[%s2730_s1 + $0x3] ss:$8 sm:$0xf]  ;;  %s1873_s13 = smov 127   ;;  %s1874_s16 = smov 1  }
   0x3   :  { %v1439_v21 = vld [vmem:[%s2730_s1 + $0x5] ss:$8 sm:$0xf]  ;;  %v1440_v26 = vld [vmem:[%s2730_s1 + $0x6] ss:$8 sm:$0xf] }
   0x4   :  { %v1934_v3 = vsub.s32 2, %v52_v1  ;;  %v1936_v4 = vsub.s32 0, %v52_v1  ;;  %v1938_v5 = vsub.s32 3, %v52_v1  ;;  %v1940_v6 = vsub.s32 1, %v52_v1  ;;  %s1875_s21 = smov 15   ;;  %s1876_s22 = smov 16  }
   0x5   :  { %v1441_v29 = vld [vmem:[%s2730_s1 + $0x7] ss:$8 sm:$0xf]  ;;  %v1442_v36 = vld [vmem:[%s2730_s1 + $0x20] ss:$8 sm:$0xf] }
   0x6   :  { %v101_v7 = vrot.slane %v1435_v2, %v1934_v3  ;;  %v93_v8 = vrot.slane %v1435_v2, %v1936_v4  ;;  %v105_v9 = vrot.slane %v1435_v2, %v1938_v5  ;;  %v97_v10 = vrot.slane %v1435_v2, %v1940_v6  ;;  %s1877_s25 = smov 17   ;;  %v33_v41 = vld [vmem:[%s2730_s1] ss:$8 sm:$0xf]  ;;  %s1878_s17 = smov 111  }
   0x7   :  { %v136_v12 = vrot.slane %v1436_v11, %v1940_v6  ;;  %v132_v13 = vrot.slane %v1436_v11, %v1936_v4  ;;  %v144_v14 = vrot.slane %v1436_v11, %v1938_v5  ;;  %v140_v15 = vrot.slane %v1436_v11, %v1934_v3  ;;  %v1438_v42 = vld [vmem:[%s2730_s1 + $0x4] ss:$8 sm:$0xf]  ;;  %s1879_s18 = smov 126   ;;  %s1880_s19 = smov 110  }
   0x8   :  { %110 = vrot.lane.b32.xlu1 %v101_v7, %s1871_s29  ;;  %106 = vrot.lane.b32.xlu0 %v93_v8, %s1871_s29  ;;  %v175_v17 = vrot.slane %v1437_v16, %v1940_v6  ;;  %v171_v18 = vrot.slane %v1437_v16, %v1936_v4  ;;  %v183_v19 = vrot.slane %v1437_v16, %v1938_v5  ;;  %v2023_v49 = vld [vmem:[%s2731_s0 + $0x18] sm:$0xff]  ;;  %v2028_v50 = vld [vmem:[%s2731_s0 + $0x10] sm:$0xff]  ;;  %vm256_vm3 = vcmask 7168   ;;  %s1881_s20 = smov 96  }
   0x9   :  { %v179_v20 = vrot.slane %v1437_v16, %v1934_v3  ;;  %v239_v22 = vrot.slane %v1439_v21, %v1940_v6  ;;  %v235_v23 = vrot.slane %v1439_v21, %v1936_v4  ;;  %v247_v24 = vrot.slane %v1439_v21, %v1938_v5  ;;  %v2033_v51 = vld [vmem:[%s2731_s0] sm:$0xff]  ;;  %v2038_v52 = vld [vmem:[%s2731_s0 + $0x8] sm:$0xff] }
   0xa   :  { %v243_v25 = vrot.slane %v1439_v21, %v1934_v3  ;;  %v278_v27 = vrot.slane %v1440_v26, %v1940_v6  ;;  %v274_v28 = vrot.slane %v1440_v26, %v1936_v4  ;;  %v313_v30 = vrot.slane %v1441_v29, %v1936_v4 }
   0xb   :  { %v282_v31 = vrot.slane %v1440_v26, %v1934_v3  ;;  %v321_v32 = vrot.slane %v1441_v29, %v1934_v3  ;;  %v317_v33 = vrot.slane %v1441_v29, %v1940_v6  ;;  %v325_v34 = vrot.slane %v1441_v29, %v1938_v5 }
   0xc   :  { %112 = vrot.lane.b32.xlu1 %v105_v9, %s1871_s29  ;;  %108 = vrot.lane.b32.xlu0 %v97_v10, %s1871_s29  ;;  %v286_v35 = vrot.slane %v1440_v26, %v1938_v5  ;;  %v356_v37 = vrot.slane %v1442_v36, %v1940_v6  ;;  %v352_v38 = vrot.slane %v1442_v36, %v1936_v4  ;;  %vm295_vm4 = vcmask 121856  }
   0xd   :  { %v360_v39 = vrot.slane %v1442_v36, %v1934_v3  ;;  %v364_v40 = vrot.slane %v1442_v36, %v1938_v5  ;;  %v58_v43 = vrot.slane %v33_v41, %v1940_v6  ;;  %v54_v44 = vrot.slane %v33_v41, %v1936_v4 }
   0xe   :  { %v2007_v45 = vrot.slane %v1438_v42, %v1934_v3  ;;  %v2012_v46 = vrot.slane %v1438_v42, %v1938_v5  ;;  %v2015_v47 = vrot.slane %v1438_v42, %v1936_v4  ;;  %v2018_v48 = vrot.slane %v1438_v42, %v1940_v6 }
   0xf   :  { %v66_v53 = vrot.slane %v33_v41, %v1938_v5  ;;  %v62_v54 = vrot.slane %v33_v41, %v1934_v3  ;;  %vm334_vm5 = vcmask 130048   ;;  %vm373_vm6 = vcmask 138240  }
  0x10   :  { %147 = vrot.lane.b32.xlu1 %v136_v12, %s1872_s10  ;;  %145 = vrot.lane.b32.xlu0 %v132_v13, %s1872_s10  ;;  %v229_v55 = vmul.f32 %v2007_v45, %v2028_v50  ;;  %v230_v56 = vmul.f32 %v2012_v46, %v2023_v49  ;;  %v227_v57 = vmul.f32 %v2015_v47, %v2033_v51  ;;  %vm75_vm7 = vcmask 908288  }
  0x11   :  { %v228_v58 = vmul.f32 %v2018_v48, %v2038_v52  ;;  %vm421_vm8 = vcmask 1031168   ;;  %vm475_vm9 = vcmask 900096   ;;  %vm495_vm10 = vcmask 785408  }
  0x12   :  { %v1531_v59 = vpack.i.bf16 %v230_v56, %v229_v55  ;;  %vm515_vm11 = vcmask 777216   ;;  %vm535_vm12 = vcmask 769024   ;;  %vm708_vm13 = vcmask 588800  }
  0x13   :  { %v1526_v60 = vpack.i.bf16 %v228_v58, %v227_v57 }
  0x14   :  { %151 = vrot.lane.b32.xlu1 %v144_v14, %s1872_s10  ;;  %149 = vrot.lane.b32.xlu0 %v140_v15, %s1872_s10 }
  0x18   :  { %186 = vrot.lane.b32.xlu1 %v175_v17, %s1873_s13  ;;  %184 = vrot.lane.b32.xlu0 %v171_v18, %s1873_s13 }
  0x1c   :  { %190 = vrot.lane.b32.xlu1 %v183_v19, %s1873_s13  ;;  %188 = vrot.lane.b32.xlu0 %v179_v20, %s1873_s13 }
  0x20   :  { %250 = vrot.lane.b32.xlu1 %v239_v22, %s1874_s16  ;;  %248 = vrot.lane.b32.xlu0 %v235_v23, %s1874_s16 }
  0x24   :  { %254 = vrot.lane.b32.xlu1 %v247_v24, %s1874_s16  ;;  %252 = vrot.lane.b32.xlu0 %v243_v25, %s1874_s16 }
  0x28   :  { %289 = vrot.lane.b32.xlu1 %v278_v27, %s1875_s21  ;;  %287 = vrot.lane.b32.xlu0 %v274_v28, %s1875_s21 }
  0x2c   :  { %326 = vrot.lane.b32.xlu1 %v313_v30, %s1876_s22  ;;  %291 = vrot.lane.b32.xlu0 %v282_v31, %s1875_s21 }
  0x30   :  { %330 = vrot.lane.b32.xlu1 %v321_v32, %s1876_s22  ;;  %328 = vrot.lane.b32.xlu0 %v317_v33, %s1876_s22 }
  0x34   :  { %332 = vrot.lane.b32.xlu1 %v325_v34, %s1876_s22  ;;  %293 = vrot.lane.b32.xlu0 %v286_v35, %s1875_s21  ;;  %s1882_s21 = smov 95   ;;  %s1883_s22 = smov 94  }
  0x38   :  { %367 = vrot.lane.b32.xlu1 %v356_v37, %s1877_s25  ;;  %365 = vrot.lane.b32.xlu0 %v352_v38, %s1877_s25 }
  0x3c   :  { %369 = vrot.lane.b32.xlu0 %v360_v39, %s1877_s25  ;;  %371 = vrot.lane.b32.xlu1 %v364_v40, %s1877_s25 }
  0x40   :  { %69 = vrot.lane.b32.xlu1 %v58_v43, %s1878_s17  ;;  %67 = vrot.lane.b32.xlu0 %v54_v44, %s1878_s17 }
  0x44   :  { %73 = vrot.lane.b32.xlu1 %v66_v53, %s1878_s17  ;;  %71 = vrot.lane.b32.xlu0 %v62_v54, %s1878_s17 }
  0x48   :  { %1532 = vrot.lane.b32.xlu0 %v1531_v59, %s1878_s17  ;;  %1527 = vrot.lane.b32.xlu1 %v1526_v60, %s1878_s17 }
  0x7a   :  { %v111_v61 = vpop.permute.xlu1 %110  ;;  %v2056_v62 = vpop.permute.xlu0 %106 }
  0x7e   :  { %v2058_v63 = vpop.permute.xlu1 %112  ;;  %v109_v0 = vpop.permute.xlu0 %108 }
  0x7f   :  { %v127_v1 = vmul.f32 %v2058_v63, %v2023_v49  ;;  %v2085_v14 = vsel %vm114_vm0, %v2056_v62, %v109_v0  ;;  %v2088_v15 = vsel %vm114_vm0, %v109_v0, %v111_v61  ;;  %v2144_v41 = vsel %vm114_vm0, %v111_v61, %v2058_v63 }
  0x80   :  { %v124_v18 = vmul.f32 %v2085_v14, %v2033_v51  ;;  %v125_v19 = vmul.f32 %v2088_v15, %v2038_v52  ;;  %v126_v56 = vmul.f32 %v2144_v41, %v2028_v50  ;;  %v123_v61 = vmul.f32 0.0, %v2056_v62 }
  0x81   :  { %400 = vrot.lane.b32.xlu0 %v127_v1, %s1873_s13 }
  0x82   :  { %v148_v2 = vpop.permute.xlu1 %147  ;;  %v2063_v3 = vpop.permute.xlu0 %145  ;;  %v1536_v26 = vpack.i.bf16 %v125_v19, %v124_v18 }
  0x83   :  { %v2105_v22 = vsel %vm153_vm1, %v2063_v3, %v148_v2  ;;  %v162_v18 = vmul.f32 0.0, %v2063_v3 }
  0x84   :  { %v163_v28 = vmul.f32 %v2105_v22, %v2033_v51 }
  0x86   :  { %v2065_v4 = vpop.permute.xlu1 %151  ;;  %v150_v5 = vpop.permute.xlu0 %149 }
  0x87   :  { %v166_v6 = vmul.f32 %v2065_v4, %v2023_v49  ;;  %v2100_v21 = vsel %vm153_vm1, %v148_v2, %v150_v5  ;;  %v2158_v57 = vsel %vm153_vm1, %v150_v5, %v2065_v4 }
  0x88   :  { %v164_v25 = vmul.f32 %v2100_v21, %v2038_v52 }
  0x89   :  { %419 = vrot.lane.b32.xlu1 %v166_v6, %s1879_s18  ;;  %v165_v6 = vmul.f32 %v2158_v57, %v2028_v50 }
  0x8a   :  { %v187_v7 = vpop.permute.xlu1 %186  ;;  %v2070_v8 = vpop.permute.xlu0 %184  ;;  %v1546_v33 = vpack.i.bf16 %v164_v25, %v163_v28 }
  0x8b   :  { %v2122_v29 = vsel %vm192_vm2, %v2070_v8, %v187_v7  ;;  %v1551_v28 = vpack.i.bf16 %v162_v18, %v165_v6 }
  0x8c   :  { %v202_v35 = vmul.f32 %v2122_v29, %v2033_v51 }
  0x8e   :  { %v2072_v9 = vpop.permute.xlu1 %190  ;;  %v2074_v10 = vpop.permute.xlu0 %188 }
  0x8f   :  { %v205_v11 = vmul.f32 %v2072_v9, %v2023_v49  ;;  %v2115_v27 = vsel %vm192_vm2, %v187_v7, %v2074_v10  ;;  %v1541_v7 = vpack.i.bf16 %v123_v61, %v126_v56 }
  0x90   :  { %v203_v32 = vmul.f32 %v2115_v27, %v2038_v52 }
  0x91   :  { %439 = vrot.lane.b32.xlu0 %v205_v11, %s1871_s29  ;;  %v2185_v11 = vsel %vm192_vm2, %v2074_v10, %v2072_v9 }
  0x92   :  { %v2079_v12 = vpop.permute.xlu1 %250  ;;  %v2081_v13 = vpop.permute.xlu0 %248  ;;  %v1556_v39 = vpack.i.bf16 %v203_v32, %v202_v35  ;;  %v201_v32 = vmul.f32 0.0, %v2070_v8 }
  0x93   :  { %v2131_v34 = vsel %vm256_vm3, %v2081_v13, %v2079_v12  ;;  %v265_v38 = vmul.f32 %v2081_v13, %v2033_v51 }
  0x94   :  { %v266_v40 = vmul.f32 %v2131_v34, %v2038_v52 }
  0x96   :  { %v2090_v16 = vpop.permute.xlu1 %254  ;;  %v2092_v17 = vpop.permute.xlu0 %252  ;;  %v1566_v55 = vpack.i.bf16 %v266_v40, %v265_v38 }
  0x97   :  { %v269_v20 = vmul.f32 0.0, %v2090_v16  ;;  %v2197_v10 = vsel %vm256_vm3, %v2079_v12, %v2092_v17  ;;  %v2202_v3 = vsel %vm256_vm3, %v2092_v17, %v2090_v16 }
  0x98   :  { %v267_v16 = vmul.f32 %v2197_v10, %v2028_v50  ;;  %v268_v8 = vmul.f32 %v2202_v3, %v2023_v49 }
  0x99   :  { %473 = vrot.lane.b32.xlu1 %v269_v20, %s1880_s19 }
  0x9a   :  { %v2107_v23 = vpop.permute.xlu1 %289  ;;  %v2109_v24 = vpop.permute.xlu0 %287  ;;  %v1571_v56 = vpack.i.bf16 %v268_v8, %v267_v16 }
  0x9b   :  { %v2221_v17 = vsel %vm295_vm4, %v2109_v24, %v2107_v23  ;;  %v304_v40 = vmul.f32 %v2109_v24, %v2033_v51 }
  0x9d   :  { %1537 = vrot.lane.b32.xlu1 %v1536_v26, %s1873_s13  ;;  %v204_v26 = vmul.f32 %v2185_v11, %v2028_v50 }
  0x9e   :  { %v2124_v30 = vpop.permute.xlu1 %326  ;;  %v292_v31 = vpop.permute.xlu0 %291 }
  0x9f   :  { %v2148_v42 = vsel %vm295_vm4, %v2107_v23, %v292_v31  ;;  %v1561_v38 = vpack.i.bf16 %v201_v32, %v204_v26 }
  0xa0   :  { %v306_v58 = vmul.f32 %v2148_v42, %v2028_v50 }
  0xa1   :  { %1547 = vrot.lane.b32.xlu1 %v1546_v33, %s1879_s18 }
  0xa2   :  { %v331_v36 = vpop.permute.xlu1 %330  ;;  %v2136_v37 = vpop.permute.xlu0 %328 }
  0xa3   :  { %v2172_v0 = vsel %vm334_vm5, %v2136_v37, %v331_v36 }
  0xa4   :  { %v345_v19 = vmul.f32 %v2172_v0, %v2028_v50 }
  0xa5   :  { %1557 = vrot.lane.b32.xlu1 %v1556_v39, %s1871_s29 }
  0xa6   :  { %v333_v43 = vpop.permute.xlu1 %332  ;;  %v294_v44 = vpop.permute.xlu0 %293 }
  0xa7   :  { %v2152_v53 = vsel %vm295_vm4, %v292_v31, %v294_v44  ;;  %v308_v54 = vmul.f32 0.0, %v294_v44  ;;  %v2163_v59 = vsel %vm334_vm5, %v331_v36, %v333_v43  ;;  %v347_v33 = vmul.f32 0.0, %v333_v43 }
  0xa8   :  { %v307_v60 = vmul.f32 %v2152_v53, %v2023_v49  ;;  %v346_v62 = vmul.f32 %v2163_v59, %v2023_v49  ;;  %v305_v43 = vmul.f32 %v2221_v17, %v2038_v52 }
  0xa9   :  { %493 = vrot.lane.b32.xlu0 %v308_v54, %s1881_s20  ;;  %1567 = vrot.lane.b32.xlu1 %v1566_v55, %s1880_s19 }
  0xaa   :  { %v1581_v1 = vpack.i.bf16 %v307_v60, %v306_v58  ;;  %v2174_v2 = vpop.permute.xlu1 %367  ;;  %v2176_v5 = vpop.permute.xlu0 %365  ;;  %v1591_v31 = vpack.i.bf16 %v346_v62, %v345_v19  ;;  %v2246_v60 = vsel %vm334_vm5, %v2124_v30, %v2136_v37  ;;  %v343_v62 = vmul.f32 %v2124_v30, %v2033_v51 }
  0xab   :  { %v2210_v35 = vsel %vm373_vm6, %v2176_v5, %v2174_v2  ;;  %v344_v19 = vmul.f32 %v2246_v60, %v2038_v52  ;;  %v382_v8 = vmul.f32 %v2176_v5, %v2033_v51 }
  0xac   :  { %2757 = vst [vmem:[#allocation2_spill] sm:$0xff] %v2210_v35  ;;  %v383_v39 = vmul.f32 %v2210_v35, %v2038_v52 }
  0xad   :  { %1542 = vrot.lane.b32.xlu0 %v1541_v7, %s1873_s13  ;;  %1582 = vrot.lane.b32.xlu1 %v1581_v1, %s1881_s20  ;;  %v1576_v7 = vpack.i.bf16 %v305_v43, %v304_v40  ;;  %v1586_v16 = vpack.i.bf16 %v344_v19, %v343_v62 }
  0xae   :  { %v370_v20 = vpop.permute.xlu0 %369  ;;  %v372_v25 = vpop.permute.xlu1 %371 }
  0xaf   :  { %v2232_v44 = vsel %vm373_vm6, %v370_v20, %v372_v25 }
  0xb0   :  { %2758 = vst [vmem:[#allocation3_spill] sm:$0xff] %v2232_v44  ;;  %v385_v61 = vmul.f32 %v2232_v44, %v2023_v49 }
  0xb1   :  { %1552 = vrot.lane.b32.xlu0 %v1551_v28, %s1879_s18  ;;  %1592 = vrot.lane.b32.xlu1 %v1591_v31, %s1882_s21 }
  0xb2   :  { %v70_v12 = vpop.permute.xlu1 %69  ;;  %v2212_v36 = vpop.permute.xlu0 %67 }
  0xb3   :  { %v2236_v23 = vsel %vm75_vm7, %v2212_v36, %v70_v12 }
  0xb4   :  { %v85_v1 = vmul.f32 %v2236_v23, %v2033_v51  ;;  %v386_v51 = vmul.f32 0.0, %v372_v25 }
  0xb5   :  { %1562 = vrot.lane.b32.xlu0 %v1561_v38, %s1871_s29  ;;  %513 = vrot.lane.b32.xlu1 %v347_v33, %s1882_s21  ;;  %v2270_v38 = vsel %vm373_vm6, %v2174_v2, %v370_v20 }
  0xb6   :  { %v2238_v54 = vpop.permute.xlu1 %73  ;;  %v72_v55 = vpop.permute.xlu0 %71 }
  0xb7   :  { %2759 = vst [vmem:[#allocation4_spill] sm:$0xff] %v2238_v54  ;;  %v2241_v58 = vsel %vm75_vm7, %v70_v12, %v72_v55  ;;  %v2278_v40 = vsel %vm75_vm7, %v72_v55, %v2238_v54  ;;  %v88_v43 = vmul.f32 %v2238_v54, %v2023_v49 }
  0xb8   :  { %v86_v6 = vmul.f32 %v2241_v58, %v2038_v52  ;;  %2760 = vst [vmem:[#allocation5_spill] sm:$0xff] %v2278_v40  ;;  %v87_v2 = vmul.f32 %v2278_v40, %v2028_v50 }
  0xb9   :  { %1572 = vrot.lane.b32.xlu0 %v1571_v56, %s1880_s19  ;;  %527 = vrot.lane.b32.xlu1 %v383_v39, %s1883_s22  ;;  %v384_v39 = vmul.f32 %v2270_v38, %v2028_v50 }
  0xba   :  { %v1533_v37 = vpop.permute.xlu0 %1532  ;;  %v1528_v18 = vpop.permute.xlu1 %1527  ;;  %v1596_v32 = vpack.i.bf16 %v86_v6, %v85_v1  ;;  %v1601_v56 = vpack.i.bf16 %v88_v43, %v87_v2 }
  0xbb   :  { %v1534_v26 = vunpack.i.l.bf16 %v1533_v37  ;;  %v1530_v28 = vunpack.i.h.bf16 %v1528_v18  ;;  %v1529_v31 = vunpack.i.l.bf16 %v1528_v18  ;;  %v1535_v20 = vunpack.i.h.bf16 %v1533_v37 }
  0xbd   :  { %1577 = vrot.lane.b32.xlu0 %v1576_v7, %s1881_s20  ;;  %531 = vrot.lane.b32.xlu1 %v385_v61, %s1883_s22  ;;  %v457_v33 = vsel %vm75_vm7, %v1529_v31, %v1530_v28  ;;  %v458_v12 = vsel %vm75_vm7, %v1530_v28, %v1534_v26  ;;  %v459_v61 = vsel %vm75_vm7, %v1534_v26, %v1535_v20 }
  0xbe   :  { %v1606_v52 = vpack.i.bf16 %v458_v12, %v457_v33  ;;  %v1611_v1 = vpack.i.bf16 %v1535_v20, %v459_v61 }
  0xc1   :  { %1587 = vrot.lane.b32.xlu0 %v1586_v16, %s1882_s21  ;;  %1597 = vrot.lane.b32.xlu1 %v1596_v32, %s1877_s25 }
  0xc5   :  { %525 = vrot.lane.b32.xlu0 %v382_v8, %s1883_s22  ;;  %1607 = vrot.lane.b32.xlu1 %v1606_v52, %s1877_s25 }
  0xc9   :  { %529 = vrot.lane.b32.xlu0 %v384_v39, %s1883_s22 }
  0xcd   :  { %533 = vrot.lane.b32.xlu0 %v386_v51, %s1883_s22 }
  0xd1   :  { %1602 = vrot.lane.b32.xlu0 %v1601_v56, %s1877_s25 }
  0xd5   :  { %1612 = vrot.lane.b32.xlu0 %v1611_v1, %s1877_s25 }
  0xf3   :  { %v401_v49 = vpop.permute.xlu0 %400 }
  0xfb   :  { %v2289_v55 = vpop.permute.xlu1 %419 }
 0x103   :  { %v2293_v7 = vpop.permute.xlu0 %439 }
 0x10b   :  { %v2291_v25 = vpop.permute.xlu1 %473 }
 0x10f   :  { %v1538_v6 = vpop.permute.xlu1 %1537 }
 0x110   :  { %v1540_v43 = vunpack.i.h.bf16 %v1538_v6  ;;  %v1539_v2 = vunpack.i.l.bf16 %v1538_v6 }
 0x113   :  { %v1548_v62 = vpop.permute.xlu1 %1547 }
 0x114   :  { %v1550_v6 = vunpack.i.h.bf16 %v1548_v62  ;;  %v1549_v40 = vunpack.i.l.bf16 %v1548_v62 }
 0x117   :  { %v1558_v50 = vpop.permute.xlu1 %1557 }
 0x118   :  { %v1559_v35 = vunpack.i.l.bf16 %v1558_v50 }
 0x11b   :  { %v2295_v37 = vpop.permute.xlu0 %493  ;;  %v2297_v18 = vpop.permute.xlu1 %1567 }
 0x11c   :  { %2761 = vst [vmem:[#allocation6_spill] sm:$0xff] %v2295_v37  ;;  %v2739_v19 = vunpack.i.l.bf16 %v2297_v18 }
 0x11e   :  { %v1616_v26 = vpack.i.bf16 %v2739_v19, %v1529_v31  ;;  %v84_v19 = vmul.f32 0.0, %v2212_v36 }
 0x11f   :  { %v2302_v28 = vpop.permute.xlu0 %1542 }
 0x120   :  { %2762 = vst [vmem:[#allocation7_spill] sm:$0xff] %v2302_v28  ;;  %1617 = vrot.lane.b32.xlu1 %v1616_v26, %s1877_s25  ;;  %v2746_v8 = vunpack.i.h.bf16 %v2302_v28  ;;  %v1544_v52 = vunpack.i.l.bf16 %v2302_v28 }
 0x122   :  { %v404_v1 = vsel %vm192_vm2, %v1540_v43, %v1544_v52  ;;  %v402_v26 = vsel %vm192_vm2, %v2746_v8, %v1539_v2  ;;  %v405_v36 = vsel %vm192_vm2, %v1544_v52, %v401_v49 }
 0x123   :  { %v2305_v32 = vpop.permute.xlu0 %1552  ;;  %v1631_v54 = vpack.i.bf16 %v402_v26, %v84_v19  ;;  %v1583_v26 = vpop.permute.xlu1 %1582 }
 0x124   :  { %v1554_v56 = vunpack.i.l.bf16 %v2305_v32  ;;  %v2748_v62 = vunpack.i.h.bf16 %v2305_v32 }
 0x126   :  { %v424_v8 = vsel %vm421_vm8, %v1550_v6, %v1554_v56 }
 0x127   :  { %v2307_v33 = vpop.permute.xlu0 %1562 }
 0x128   :  { %v2749_v44 = vunpack.i.h.bf16 %v2307_v33  ;;  %v1564_v28 = vunpack.i.l.bf16 %v2307_v33 }
 0x12b   :  { %v1573_v12 = vpop.permute.xlu0 %1572 }
 0x12c   :  { %v1574_v52 = vunpack.i.l.bf16 %v1573_v12 }
 0x12f   :  { %v2309_v16 = vpop.permute.xlu0 %1577 }
 0x130   :  { %v2742_v51 = vunpack.i.l.bf16 %v2309_v16 }
 0x133   :  { %v2313_v39 = vpop.permute.xlu0 %1587 }
 0x134   :  { %v2741_v31 = vunpack.i.l.bf16 %v2313_v39 }
 0x136   :  { %v1621_v20 = vpack.i.bf16 %v2741_v31, %v2742_v51  ;;  %v403_v31 = vsel %vm192_vm2, %v1539_v2, %v1540_v43  ;;  %v1636_v43 = vpack.i.bf16 %v401_v49, %v405_v36  ;;  %v441_v2 = vsel %vm114_vm0, %v2749_v44, %v1559_v35 }
 0x137   :  { %v2322_v61 = vpop.permute.xlu0 %525  ;;  %v1626_v51 = vpack.i.bf16 %v404_v1, %v403_v31  ;;  %v423_v31 = vsel %vm421_vm8, %v1549_v40, %v1550_v6  ;;  %v444_v6 = vsel %vm114_vm0, %v1564_v28, %v2293_v7  ;;  %v425_v36 = vsel %vm421_vm8, %v1554_v56, %v2289_v55 }
 0x138   :  { %1622 = vrot.lane.b32.xlu0 %v1621_v20, %s1877_s25  ;;  %626 = vrot.lane.b32.xlu1 %v2322_v61, %s1877_s25  ;;  %v1560_v20 = vunpack.i.h.bf16 %v1558_v50  ;;  %v1641_v19 = vpack.i.bf16 %v424_v8, %v423_v31  ;;  %v1570_v31 = vunpack.i.h.bf16 %v2297_v18 }
 0x13a   :  { %v443_v1 = vsel %vm114_vm0, %v1560_v20, %v1564_v28  ;;  %v442_v50 = vsel %vm114_vm0, %v1559_v35, %v1560_v20  ;;  %v1661_v35 = vpack.i.bf16 %v2293_v7, %v444_v6  ;;  %v1656_v20 = vpack.i.bf16 %v2289_v55, %v425_v36 }
 0x13b   :  { %v1646_v49 = vpack.i.bf16 %v443_v1, %v442_v50  ;;  %v1590_v28 = vunpack.i.h.bf16 %v2313_v39  ;;  %v2763_v7 = vunpack.i.l.bf16 %v2297_v18  ;;  %v2765_v6 = vunpack.i.l.bf16 %v2313_v39 }
 0x13c   :  { %1627 = vrot.lane.b32.xlu0 %v1626_v51, %s1877_s25  ;;  %1632 = vrot.lane.b32.xlu1 %v1631_v54, %s1877_s25  ;;  %v422_v54 = vsel %vm421_vm8, %v2748_v62, %v1549_v40  ;;  %v1575_v51 = vunpack.i.h.bf16 %v1573_v12  ;;  %v1593_v40 = vpop.permute.xlu1 %1592  ;;  %v477_v12 = vsel %vm475_vm9, %v1570_v31, %v1574_v52 }
 0x13d   :  { %v1651_v8 = vpack.i.bf16 %v441_v2, %v422_v54  ;;  %v1584_v2 = vunpack.i.l.bf16 %v1583_v26  ;;  %v1594_v1 = vunpack.i.l.bf16 %v1593_v40  ;;  %v476_v55 = vsel %vm475_vm9, %v2763_v7, %v1570_v31  ;;  %v530_v7 = vpop.permute.xlu0 %529 }
 0x13e   :  { %v478_v56 = vsel %vm475_vm9, %v1574_v52, %v1575_v51  ;;  %v1585_v54 = vunpack.i.h.bf16 %v1583_v26  ;;  %v1666_v50 = vpack.i.bf16 %v477_v12, %v476_v55  ;;  %v2764_v52 = vunpack.i.l.bf16 %v2309_v16 }
 0x13f   :  { %v516_v36 = vsel %vm515_vm11, %v2765_v6, %v1590_v28  ;;  %v1595_v26 = vunpack.i.h.bf16 %v1593_v40 }
 0x140   :  { %1642 = vrot.lane.b32.xlu0 %v1641_v19, %s1877_s25  ;;  %1637 = vrot.lane.b32.xlu1 %v1636_v43, %s1877_s25  ;;  %v1580_v19 = vunpack.i.h.bf16 %v2309_v16  ;;  %v479_v43 = vsel %vm475_vm9, %v1575_v51, %v2291_v25  ;;  %v2379_v18 = vpop.permute.xlu1 %513  ;;  %v498_v12 = vsel %vm495_vm10, %v1584_v2, %v1585_v54  ;;  %v499_v39 = vsel %vm495_vm10, %v1585_v54, %v2295_v37 }
 0x141   :  { %2766 = vst [vmem:[#allocation8_spill] sm:$0xff] %v2379_v18  ;;  %v519_v16 = vsel %vm515_vm11, %v1595_v26, %v2379_v18  ;;  %v518_v40 = vsel %vm515_vm11, %v1594_v1, %v1595_v26  ;;  %v2398_v54 = vpop.permute.xlu0 %533 }
 0x142   :  { %v497_v51 = vsel %vm495_vm10, %v1580_v19, %v1584_v2  ;;  %2767 = vst [vmem:[#allocation9_spill] sm:$0xff] %v2398_v54 }
 0x144   :  { %1652 = vrot.lane.b32.xlu0 %v1651_v8, %s1877_s25  ;;  %1647 = vrot.lane.b32.xlu1 %v1646_v49, %s1877_s25  ;;  %v1671_v8 = vpack.i.bf16 %v479_v43, %v478_v56  ;;  %v496_v49 = vsel %vm495_vm10, %v2764_v52, %v1580_v19  ;;  %v2750_v19 = vmov 0.0   ;;  %v1686_v56 = vpack.i.bf16 %v499_v39, %v498_v12  ;;  %v528_v43 = vpop.permute.xlu1 %527 }
 0x145   :  { %v1676_v31 = vpack.i.bf16 %v497_v51, %v496_v49  ;;  %776 = vmatprep.mubr.f32.mxu0 %v2750_v19  ;;  %847 = vmatprep.mubr.f32.mxu1 %v2750_v19  ;;  %v537_v2 = vsel %vm535_vm12, %v528_v43, %v530_v7  ;;  %v536_v55 = vsel %vm535_vm12, %v2322_v61, %v528_v43  ;;  %v1603_v49 = vpop.permute.xlu0 %1602 }
 0x146   :  { %v1604_v43 = vunpack.i.l.bf16 %v1603_v49 }
 0x148   :  { %1662 = vrot.lane.b32.xlu0 %v1661_v35, %s1877_s25  ;;  %1657 = vrot.lane.b32.xlu1 %v1656_v20, %s1877_s25  ;;  %v517_v35 = vsel %vm515_vm11, %v1590_v28, %v1594_v1  ;;  %v1691_v28 = vpack.i.bf16 %v519_v16, %v518_v40 }
 0x149   :  { %v1681_v20 = vpack.i.bf16 %v517_v35, %v516_v36  ;;  %v2409_v61 = vpop.permute.xlu0 %1612 }
 0x14c   :  { %1667 = vrot.lane.b32.xlu0 %v1666_v50, %s1877_s25  ;;  %1672 = vrot.lane.b32.xlu1 %v1671_v8, %s1877_s25  ;;  %v532_v50 = vpop.permute.xlu1 %531 }
 0x14d   :  { %v538_v1 = vsel %vm535_vm12, %v530_v7, %v532_v50  ;;  %v539_v8 = vsel %vm535_vm12, %v532_v50, %v2398_v54 }
 0x150   :  { %1677 = vrot.lane.b32.xlu0 %v1676_v31, %s1877_s25  ;;  %1682 = vrot.lane.b32.xlu1 %v1681_v20, %s1877_s25  ;;  %v1598_v52 = vpop.permute.xlu1 %1597 }
 0x151   :  { %v1600_v26 = vunpack.i.h.bf16 %v1598_v52  ;;  %v1599_v31 = vunpack.i.l.bf16 %v1598_v52 }
 0x153   :  { %v637_v7 = vsel %vm373_vm6, %v1599_v31, %v1600_v26 }
 0x154   :  { %1692 = vrot.lane.b32.xlu0 %v1691_v28, %s1877_s25  ;;  %1687 = vrot.lane.b32.xlu1 %v1686_v56, %s1877_s25  ;;  %v2407_v51 = vpop.permute.xlu1 %1607  ;;  %v1605_v56 = vunpack.i.h.bf16 %v1603_v49  ;;  %v638_v49 = vsel %vm373_vm6, %v1600_v26, %v1604_v43 }
 0x156   :  { %v639_v19 = vsel %vm373_vm6, %v1604_v43, %v1605_v56 }
 0x158   :  { %630 = vrot.lane.b32.xlu0 %v537_v2, %s1877_s25  ;;  %628 = vrot.lane.b32.xlu1 %v536_v55, %s1877_s25 }
 0x15c   :  { %632 = vrot.lane.b32.xlu0 %v538_v1, %s1877_s25  ;;  %634 = vrot.lane.b32.xlu1 %v539_v8, %s1877_s25 }
 0x192   :  { %v2411_v6 = vpop.permute.xlu1 %1617 }
 0x1aa   :  { %v2413_v36 = vpop.permute.xlu0 %1622  ;;  %v2415_v35 = vpop.permute.xlu1 %626 }
 0x1ae   :  { %v1628_v20 = vpop.permute.xlu0 %1627  ;;  %v2417_v16 = vpop.permute.xlu1 %1632 }
 0x1af   :  { %2768 = vst [vmem:[#allocation10_spill] sm:$0xff] %v2417_v16  ;;  %v1630_v12 = vunpack.i.h.bf16 %v1628_v20  ;;  %v1629_v39 = vunpack.i.l.bf16 %v1628_v20  ;;  %v1635_v40 = vunpack.i.h.bf16 %v2417_v16  ;;  %v2755_v28 = vunpack.i.l.bf16 %v2417_v16 }
 0x1b1   :  { %v641_v2 = vsel %vm373_vm6, %v1629_v39, %v1630_v12  ;;  %v636_v55 = vsel %vm373_vm6, %v2755_v28, %v1599_v31  ;;  %v640_v50 = vsel %vm373_vm6, %v1635_v40, %v1629_v39 }
 0x1b2   :  { %v1643_v1 = vpop.permute.xlu0 %1642  ;;  %v1638_v8 = vpop.permute.xlu1 %1637  ;;  %v1447_v52 = vpack.c.bf16 %v641_v2, %v637_v7  ;;  %v1449_v20 = vpack.c.bf16 %v640_v50, %v636_v55 }
 0x1b3   :  { %v1640_v62 = vunpack.i.h.bf16 %v1638_v8  ;;  %v1639_v44 = vunpack.i.l.bf16 %v1638_v8  ;;  %v1645_v54 = vunpack.i.h.bf16 %v1643_v1  ;;  %v1644_v37 = vunpack.i.l.bf16 %v1643_v1 }
 0x1b4   :  { %1448 = vmatprep.subr.bf16.mxu0 %v1447_v52 }
 0x1b5   :  { %1450 = vmatpush1.bf16.msra.mxu0 %v1449_v20  ;;  %v643_v16 = vsel %vm373_vm6, %v1639_v44, %v1640_v62  ;;  %v642_v31 = vsel %vm373_vm6, %v1630_v12, %v1639_v44  ;;  %v645_v56 = vsel %vm373_vm6, %v1644_v37, %v1645_v54  ;;  %v1610_v44 = vunpack.i.h.bf16 %v2407_v51 }
 0x1b6   :  { %v1653_v28 = vpop.permute.xlu0 %1652  ;;  %v1648_v39 = vpop.permute.xlu1 %1647  ;;  %v1463_v40 = vpack.c.bf16 %v643_v16, %v639_v19  ;;  %v1465_v18 = vpack.c.bf16 %v642_v31, %v638_v49  ;;  %v1609_v12 = vunpack.i.l.bf16 %v2407_v51  ;;  %v1615_v49 = vunpack.i.h.bf16 %v2409_v61 }
 0x1b7   :  { %v1655_v7 = vunpack.i.h.bf16 %v1653_v28  ;;  %v1654_v2 = vunpack.i.l.bf16 %v1653_v28  ;;  %v1650_v55 = vunpack.i.h.bf16 %v1648_v39  ;;  %v1649_v50 = vunpack.i.l.bf16 %v1648_v39 }
 0x1b8   :  { %1464 = vmatprep.subr.bf16.mxu1 %v1463_v40  ;;  %v1614_v31 = vunpack.i.l.bf16 %v2409_v61  ;;  %v653_v61 = vsel %vm373_vm6, %v1609_v12, %v1610_v44 }
 0x1b9   :  { %1466 = vmatpush1.bf16.msra.mxu1 %v1465_v18  ;;  %v649_v26 = vsel %vm373_vm6, %v1649_v50, %v1650_v55  ;;  %v644_v43 = vsel %vm373_vm6, %v1654_v2, %v1644_v37  ;;  %v648_v62 = vsel %vm373_vm6, %v1655_v7, %v1649_v50  ;;  %v1619_v37 = vunpack.i.l.bf16 %v2411_v6 }
 0x1ba   :  { %v1663_v19 = vpop.permute.xlu0 %1662  ;;  %v1658_v16 = vpop.permute.xlu1 %1657  ;;  %v1451_v1 = vpack.c.bf16 %v649_v26, %v645_v56  ;;  %v1453_v28 = vpack.c.bf16 %v648_v62, %v644_v43  ;;  %v1620_v2 = vunpack.i.h.bf16 %v2411_v6 }
 0x1bb   :  { %v1665_v8 = vunpack.i.h.bf16 %v1663_v19  ;;  %v1664_v52 = vunpack.i.l.bf16 %v1663_v19  ;;  %v1660_v20 = vunpack.i.h.bf16 %v1658_v16  ;;  %v1659_v18 = vunpack.i.l.bf16 %v1658_v16 }
 0x1bc   :  { %1452 = vmatprep.subr.bf16.mxu0 %v1451_v1 }
 0x1bd   :  { %1454 = vmatpush1.bf16.msra.mxu0 %v1453_v28  ;;  %v647_v39 = vsel %vm373_vm6, %v1659_v18, %v1660_v20  ;;  %v651_v51 = vsel %vm373_vm6, %v1664_v52, %v1665_v8  ;;  %v646_v40 = vsel %vm373_vm6, %v1645_v54, %v1659_v18  ;;  %v650_v7 = vsel %vm373_vm6, %v1650_v55, %v1664_v52 }
 0x1be   :  { %v1668_v50 = vpop.permute.xlu0 %1667  ;;  %v1673_v56 = vpop.permute.xlu1 %1672  ;;  %v1467_v26 = vpack.c.bf16 %v651_v51, %v647_v39  ;;  %v1469_v43 = vpack.c.bf16 %v650_v7, %v646_v40  ;;  %v1624_v28 = vunpack.i.l.bf16 %v2413_v36  ;;  %v655_v8 = vsel %vm373_vm6, %v1614_v31, %v1615_v49 }
 0x1bf   :  { %v1670_v62 = vunpack.i.h.bf16 %v1668_v50  ;;  %v1669_v19 = vunpack.i.l.bf16 %v1668_v50  ;;  %v1675_v16 = vunpack.i.h.bf16 %v1673_v56  ;;  %v1674_v1 = vunpack.i.l.bf16 %v1673_v56 }
 0x1c0   :  { %1468 = vmatprep.subr.bf16.mxu1 %v1467_v26  ;;  %v652_v54 = vsel %vm373_vm6, %v1619_v37, %v1609_v12  ;;  %v654_v55 = vsel %vm373_vm6, %v1610_v44, %v1614_v31  ;;  %v1625_v44 = vunpack.i.h.bf16 %v2413_v36 }
 0x1c1   :  { %1470 = vmatpush1.bf16.msra.mxu1 %v1469_v43  ;;  %v657_v6 = vsel %vm373_vm6, %v1669_v19, %v1670_v62  ;;  %v659_v52 = vsel %vm373_vm6, %v1674_v1, %v1675_v16  ;;  %v656_v20 = vsel %vm373_vm6, %v1620_v2, %v1669_v19  ;;  %v658_v18 = vsel %vm373_vm6, %v1670_v62, %v1674_v1 }
 0x1c2   :  { %v1678_v39 = vpop.permute.xlu0 %1677  ;;  %v1683_v51 = vpop.permute.xlu1 %1682  ;;  %v1455_v40 = vpack.c.bf16 %v657_v6, %v653_v61  ;;  %v1471_v7 = vpack.c.bf16 %v659_v52, %v655_v8  ;;  %v1457_v50 = vpack.c.bf16 %v656_v20, %v652_v54  ;;  %v1473_v56 = vpack.c.bf16 %v658_v18, %v654_v55 }
 0x1c3   :  { %v1680_v49 = vunpack.i.h.bf16 %v1678_v39  ;;  %v1679_v26 = vunpack.i.l.bf16 %v1678_v39  ;;  %v1685_v12 = vunpack.i.h.bf16 %v1683_v51  ;;  %v1684_v37 = vunpack.i.l.bf16 %v1683_v51 }
 0x1c4   :  { %1456 = vmatprep.subr.bf16.mxu0 %v1455_v40  ;;  %1472 = vmatprep.subr.bf16.mxu1 %v1471_v7 }
 0x1c5   :  { %1458 = vmatpush1.bf16.msra.mxu0 %v1457_v50  ;;  %1474 = vmatpush1.bf16.msra.mxu1 %v1473_v56  ;;  %v661_v31 = vsel %vm373_vm6, %v1679_v26, %v1680_v49  ;;  %v665_v2 = vsel %vm373_vm6, %v1684_v37, %v1685_v12  ;;  %v660_v43 = vsel %vm373_vm6, %v1624_v28, %v1679_v26  ;;  %v540_v56 = vld [vmem:[%s2732_s2] sm:$0xff] }
 0x1c6   :  { %v1693_v61 = vpop.permute.xlu0 %1692  ;;  %v1688_v62 = vpop.permute.xlu1 %1687  ;;  %v1459_v19 = vpack.c.bf16 %v665_v2, %v661_v31  ;;  %v664_v16 = vsel %vm373_vm6, %v1625_v44, %v1684_v37  ;;  %v2769_v44 = vmov 0.0  }
 0x1c7   :  { %v1695_v1 = vunpack.i.h.bf16 %v1693_v61  ;;  %v1694_v8 = vunpack.i.l.bf16 %v1693_v61  ;;  %v1690_v54 = vunpack.i.h.bf16 %v1688_v62  ;;  %v1689_v55 = vunpack.i.l.bf16 %v1688_v62 }
 0x1c8   :  { %1460 = vmatprep.subr.bf16.mxu0 %v1459_v19  ;;  %v1461_v36 = vpack.c.bf16 %v664_v16, %v660_v43 }
 0x1c9   :  { %v663_v6 = vsel %vm373_vm6, %v1689_v55, %v1690_v54  ;;  %v667_v52 = vsel %vm373_vm6, %v1694_v8, %v1695_v1  ;;  %v662_v20 = vsel %vm373_vm6, %v1680_v49, %v1689_v55  ;;  %v666_v18 = vsel %vm373_vm6, %v1685_v12, %v1694_v8 }
 0x1ca   :  { %1462 = vmatpush1.bf16.msra.mxu0 %v1461_v36  ;;  %v631_v28 = vpop.permute.xlu0 %630  ;;  %v629_v39 = vpop.permute.xlu1 %628  ;;  %v1475_v51 = vpack.c.bf16 %v667_v52, %v663_v6  ;;  %v1477_v40 = vpack.c.bf16 %v666_v18, %v662_v20  ;;  %v1885_v52 = vmov 0  }
 0x1cb   :  { %v669_v7 = vsel %vm373_vm6, %v629_v39, %v631_v28  ;;  %v668_v50 = vsel %vm373_vm6, %v2415_v35, %v629_v39  ;;  %1696 = vset.pattern.permute.xlu0 %v1885_v52  ;;  %1697 = vset.pattern.permute.xlu1 %v1885_v52 }
 0x1cc   :  { %728 = vmatprep.subr.mxu0 %v669_v7  ;;  %1476 = vmatprep.subr.bf16.mxu1 %v1475_v51 }
 0x1cd   :  { %1478 = vmatpush1.bf16.msra.mxu1 %v1477_v40 }
 0x1ce   :  { %729 = vmatpush1.msra.mxu0 %v668_v50  ;;  %v633_v49 = vpop.permute.xlu0 %632  ;;  %v635_v26 = vpop.permute.xlu1 %634 }
 0x1cf   :  { %1443 = vmatmul.mubr.msk.f32.vlgmr.msra.gmra.mrb[0].mxu0 %vm708_vm13, %v540_v56  ;;  %v671_v12 = vsel %vm373_vm6, %v633_v49, %v635_v26  ;;  %v670_v37 = vsel %vm373_vm6, %v631_v28, %v633_v49 }
 0x1d0   :  { %799 = vmatprep.subr.mxu1 %v671_v12  ;;  %1297 = vmatprep.mubr.f32.mxu0 %v2769_v44  ;;  %v855_v12 = vld [vmem:[%s2734_s5] sm:$0xff] }
 0x1d1   :  { %800 = vmatpush1.msra.mxu1 %v670_v37 }
 0x1d2   :  { %1444 = vmatmul.mubr.msk.f32.vlgmr.msra.gmra.mrb[0].mxu1 %vm708_vm13, %v540_v56  ;;  %v854_v56 = vld [vmem:[%s2733_s4] sm:$0xff] }
 0x1d3   :  { %1368 = vmatprep.mubr.f32.mxu1 %v2769_v44 }
 0x2a2   :  { %v778_v35 = vpop.f32.mrb[0].mxu0 }
 0x2a3   :  { %v862_v31 = vmul.f32 %v778_v35, %v778_v35  ;;  %v780_v2 = vpop.f32.mrb[1].mxu0 }
 0x2a4   :  { %v856_v43 = vadd.f32 %v780_v2, %v778_v35  ;;  %v863_v61 = vmul.f32 %v780_v2, %v780_v2 }
 0x2a5   :  { %v849_v62 = vpop.f32.mrb[0].mxu1 }
 0x2a6   :  { %v864_v19 = vmul.f32 %v849_v62, %v849_v62  ;;  %v851_v16 = vpop.f32.mrb[1].mxu1  ;;  %v857_v1 = vadd.f32 %v856_v43, %v849_v62  ;;  %v866_v8 = vadd.f32 %v863_v61, %v862_v31 }
 0x2a7   :  { %v865_v54 = vmul.f32 %v851_v16, %v851_v16 }
 0x2a8   :  { %v858_v55 = vadd.f32 %v857_v1, %v851_v16  ;;  %v867_v36 = vadd.f32 %v866_v8, %v864_v19 }
 0x2aa   :  { %859 = vadd.xlane.f32.xlu0 %v858_v55  ;;  %v868_v6 = vadd.f32 %v867_v36, %v865_v54 }
 0x2ac   :  { %869 = vadd.xlane.f32.xlu1 %v868_v6 }
 0x337   :  { %v860_v20 = vpop.xlane.xlu0 %859 }
 0x338   :  { %v861_v18 = vmul.f32 0.001953125, %v860_v20 }
 0x339   :  { %v870_v28 = vpop.xlane.xlu1 %869 }
 0x33a   :  { %v872_v39 = vmul.f32 %v861_v18, %v861_v18  ;;  %v871_v51 = vmul.f32 0.001953125, %v870_v28 }
 0x33c   :  { %v873_v40 = vsub.f32 %v871_v51, %v872_v39 }
 0x33e   :  { %v874_v7 = vmax.f32 %v873_v40, 0.0 }
 0x340   :  { %v875_v50 = vadd.f32 1e-05, %v874_v7 }
 0x342   :  { %1863 = vrsqrt.f32 %v875_v50 }
 0x34c   :  { %v1864_v49 = vpop.eup %1863 }
 0x34d   :  { %v877_v26 = vmul.f32 %v1864_v49, %v854_v56 }
 0x34f   :  { %882 = vperm.xlu0 %1696, %v877_v26   ;;  %v878_v37 = vmul.f32 %v877_v26, %v861_v18 }
 0x351   :  { %v879_v44 = vsub.f32 %v855_v12, %v878_v37 }
 0x353   :  { %891 = vperm.xlu1 %1697, %v879_v44  }
 0x3ce   :  { %v883_v31 = vpop.permute.xlu0 %882 }
 0x3cf   :  { %v885_v43 = vmul.f32 %v883_v31, %v778_v35  ;;  %v886_v61 = vmul.f32 %v883_v31, %v780_v2  ;;  %v887_v19 = vmul.f32 %v883_v31, %v849_v62  ;;  %v888_v1 = vmul.f32 %v883_v31, %v851_v16 }
 0x3d2   :  { %v892_v8 = vpop.permute.xlu1 %891 }
 0x3d3   :  { %v894_v54 = vadd.f32 %v892_v8, %v885_v43  ;;  %v895_v55 = vadd.f32 %v892_v8, %v886_v61  ;;  %v896_v36 = vadd.f32 %v892_v8, %v887_v19  ;;  %v897_v6 = vadd.f32 %v892_v8, %v888_v1 }
 0x3d5   :  { %v898_v52 = vmax.f32 %v894_v54, 0.0  ;;  %v2481_v20 = vmax.f32 %v895_v55, 0.0  ;;  %v2483_v28 = vmax.f32 %v896_v36, 0.0  ;;  %v2485_v39 = vmax.f32 %v897_v6, 0.0 }
 0x3d7   :  { %v918_v18 = vmul.f32 %v898_v52, %v2015_v47  ;;  %v919_v35 = vmul.f32 %v2481_v20, %v2018_v48  ;;  %v906_v2 = vmul.f32 %v898_v52, %v2085_v14  ;;  %v907_v62 = vmul.f32 %v2481_v20, %v2088_v15 }
 0x3d8   :  { %v922_v16 = vmul.f32 %v898_v52, %v2081_v13  ;;  %v923_v51 = vmul.f32 %v2481_v20, %v2131_v34  ;;  %v908_v40 = vmul.f32 %v2483_v28, %v2144_v41  ;;  %v909_v7 = vmul.f32 %v2485_v39, %v2058_v63 }
 0x3d9   :  { %v1728_v47 = vpack.i.bf16 %v919_v35, %v918_v18  ;;  %v1698_v50 = vpack.i.bf16 %v907_v62, %v906_v2  ;;  %v926_v48 = vmul.f32 %v898_v52, %v2109_v24  ;;  %v927_v14 = vmul.f32 %v2481_v20, %v2221_v17 }
 0x3da   :  { %v1738_v56 = vpack.i.bf16 %v923_v51, %v922_v16  ;;  %v1703_v15 = vpack.i.bf16 %v909_v7, %v908_v40  ;;  %v910_v13 = vmul.f32 %v898_v52, %v2105_v22  ;;  %v911_v34 = vmul.f32 %v2481_v20, %v2100_v21  ;;  %v2772_v40 = vld [vmem:[#allocation4_spill] sm:$0xff] }
 0x3db   :  { %1729 = vrot.lane.b32.xlu0 %v1728_v47, %s1878_s17  ;;  %1699 = vrot.lane.b32.xlu1 %v1698_v50, %s1873_s13  ;;  %v1748_v41 = vpack.i.bf16 %v927_v14, %v926_v48  ;;  %v930_v63 = vmul.f32 %v898_v52, %v2124_v30  ;;  %v931_v24 = vmul.f32 %v2481_v20, %v2246_v60 }
 0x3dc   :  { %v1708_v49 = vpack.i.bf16 %v911_v34, %v910_v13  ;;  %v912_v17 = vmul.f32 %v2483_v28, %v2158_v57  ;;  %v913_v22 = vmul.f32 %v2485_v39, %v2065_v4  ;;  %v914_v21 = vmul.f32 %v898_v52, %v2122_v29 }
 0x3dd   :  { %v1758_v26 = vpack.i.bf16 %v931_v24, %v930_v63  ;;  %v915_v12 = vmul.f32 %v2481_v20, %v2115_v27  ;;  %v916_v30 = vmul.f32 %v2483_v28, %v2185_v11  ;;  %v917_v60 = vmul.f32 %v2485_v39, %v2072_v9 }
 0x3de   :  { %v1713_v37 = vpack.i.bf16 %v913_v22, %v912_v17  ;;  %v920_v44 = vmul.f32 %v2483_v28, %v2007_v45  ;;  %v921_v29 = vmul.f32 %v2485_v39, %v2012_v46  ;;  %v902_v27 = vmul.f32 %v898_v52, %v2236_v23 }
 0x3df   :  { %1739 = vrot.lane.b32.xlu0 %v1738_v56, %s1880_s19  ;;  %1704 = vrot.lane.b32.xlu1 %v1703_v15, %s1873_s13  ;;  %v1718_v4 = vpack.i.bf16 %v915_v12, %v914_v21  ;;  %v1723_v57 = vpack.i.bf16 %v917_v60, %v916_v30  ;;  %v903_v11 = vmul.f32 %v2481_v20, %v2241_v58  ;;  %v2773_v56 = vld [vmem:[#allocation7_spill] sm:$0xff] }
 0x3e0   :  { %v924_v9 = vmul.f32 %v2483_v28, %v2197_v10  ;;  %v925_v45 = vmul.f32 %v2485_v39, %v2202_v3  ;;  %v1733_v31 = vpack.i.bf16 %v921_v29, %v920_v44  ;;  %v928_v43 = vmul.f32 %v2483_v28, %v2148_v42 }
 0x3e1   :  { %v929_v61 = vmul.f32 %v2485_v39, %v2152_v53  ;;  %v932_v46 = vmul.f32 %v2483_v28, %v2172_v0  ;;  %v1768_v23 = vpack.i.bf16 %v903_v11, %v902_v27  ;;  %v933_v58 = vmul.f32 %v2485_v39, %v2163_v59  ;;  %v2770_v59 = vld [vmem:[#allocation2_spill] sm:$0xff] }
 0x3e2   :  { %v1743_v19 = vpack.i.bf16 %v925_v45, %v924_v9  ;;  %v934_v42 = vmul.f32 %v898_v52, %v2176_v5  ;;  %v936_v53 = vmul.f32 %v2483_v28, %v2270_v38  ;;  %v935_v0 = vmul.f32 %v2481_v20, %v2770_v59  ;;  %v2771_v5 = vld [vmem:[#allocation3_spill] sm:$0xff] }
 0x3e3   :  { %1749 = vrot.lane.b32.xlu0 %v1748_v41, %s1881_s20  ;;  %1709 = vrot.lane.b32.xlu1 %v1708_v49, %s1879_s18  ;;  %v1753_v10 = vpack.i.bf16 %v929_v61, %v928_v43  ;;  %v1763_v3 = vpack.i.bf16 %v933_v58, %v932_v46  ;;  %v937_v38 = vmul.f32 %v2485_v39, %v2771_v5  ;;  %v2774_v15 = vunpack.i.h.bf16 %v2773_v56  ;;  %v2775_v49 = vld [vmem:[#allocation5_spill] sm:$0xff] }
 0x3e4   :  { %v905_v7 = vmul.f32 %v2485_v39, %v2772_v40  ;;  %v904_v39 = vmul.f32 %v2483_v28, %v2775_v49 }
 0x3e7   :  { %1759 = vrot.lane.b32.xlu0 %v1758_v26, %s1882_s21  ;;  %1714 = vrot.lane.b32.xlu1 %v1713_v37, %s1879_s18 }
 0x3eb   :  { %1053 = vrot.lane.b32.xlu0 %v934_v42, %s1883_s22  ;;  %1719 = vrot.lane.b32.xlu1 %v1718_v4, %s1871_s29  ;;  %v2776_v4 = vunpack.i.h.bf16 %v2307_v33  ;;  %v2777_v33 = vunpack.i.h.bf16 %v2305_v32 }
 0x3ef   :  { %1057 = vrot.lane.b32.xlu0 %v936_v53, %s1883_s22  ;;  %1724 = vrot.lane.b32.xlu1 %v1723_v57, %s1871_s29 }
 0x3f3   :  { %1734 = vrot.lane.b32.xlu1 %v1733_v31, %s1878_s17  ;;  %1769 = vrot.lane.b32.xlu0 %v1768_v23, %s1877_s25 }
 0x3f7   :  { %1744 = vrot.lane.b32.xlu1 %v1743_v19, %s1880_s19 }
 0x3fb   :  { %1754 = vrot.lane.b32.xlu1 %v1753_v10, %s1881_s20 }
 0x3ff   :  { %1764 = vrot.lane.b32.xlu1 %v1763_v3, %s1882_s21 }
 0x403   :  { %1055 = vrot.lane.b32.xlu1 %v935_v0, %s1883_s22 }
 0x407   :  { %1059 = vrot.lane.b32.xlu1 %v937_v38, %s1883_s22 }
 0x44d   :  { %v2565_v1 = vpop.permute.xlu0 %1729  ;;  %v1700_v8 = vpop.permute.xlu1 %1699 }
 0x44e   :  { %v1702_v54 = vunpack.i.h.bf16 %v1700_v8  ;;  %v1701_v55 = vunpack.i.l.bf16 %v1700_v8  ;;  %v1732_v27 = vunpack.i.h.bf16 %v2565_v1  ;;  %v1731_v57 = vunpack.i.l.bf16 %v2565_v1 }
 0x450   :  { %v951_v35 = vsel %vm192_vm2, %v1701_v55, %v1702_v54  ;;  %v950_v13 = vsel %vm192_vm2, %v2774_v15, %v1701_v55  ;;  %v998_v23 = vsel %vm75_vm7, %v1731_v57, %v1732_v27 }
 0x451   :  { %v2567_v36 = vpop.permute.xlu0 %1739  ;;  %v1705_v6 = vpop.permute.xlu1 %1704  ;;  %v1778_v26 = vpack.i.bf16 %v904_v39, %v950_v13 }
 0x452   :  { %v1707_v52 = vunpack.i.h.bf16 %v1705_v6  ;;  %v1706_v18 = vunpack.i.l.bf16 %v1705_v6  ;;  %v1742_v53 = vunpack.i.h.bf16 %v2567_v36  ;;  %v1741_v32 = vunpack.i.l.bf16 %v2567_v36 }
 0x454   :  { %v952_v20 = vsel %vm192_vm2, %v1702_v54, %v1706_v18  ;;  %v953_v51 = vsel %vm192_vm2, %v1706_v18, %v1707_v52  ;;  %v1013_v18 = vsel %vm475_vm9, %v1741_v32, %v1742_v53 }
 0x455   :  { %v1773_v2 = vpack.i.bf16 %v952_v20, %v951_v35  ;;  %v2571_v62 = vpop.permute.xlu0 %1749  ;;  %v1710_v16 = vpop.permute.xlu1 %1709  ;;  %v1783_v47 = vpack.i.bf16 %v953_v51, %v905_v7 }
 0x456   :  { %v1712_v34 = vunpack.i.h.bf16 %v1710_v16  ;;  %v1711_v41 = vunpack.i.l.bf16 %v1710_v16  ;;  %v1752_v36 = vunpack.i.h.bf16 %v2571_v62 }
 0x457   :  { %1774 = vrot.lane.b32.xlu1 %v1773_v2, %s1877_s25 }
 0x458   :  { %v967_v30 = vsel %vm421_vm8, %v1711_v41, %v1712_v34  ;;  %v966_v46 = vsel %vm421_vm8, %v2777_v33, %v1711_v41 }
 0x459   :  { %v2577_v50 = vpop.permute.xlu0 %1759  ;;  %v1715_v48 = vpop.permute.xlu1 %1714  ;;  %v1788_v11 = vpack.i.bf16 %v967_v30, %v1707_v52 }
 0x45a   :  { %v1716_v14 = vunpack.i.l.bf16 %v1715_v48  ;;  %v1717_v21 = vunpack.i.h.bf16 %v1715_v48  ;;  %v1762_v35 = vunpack.i.h.bf16 %v2577_v50  ;;  %v1761_v20 = vunpack.i.l.bf16 %v2577_v50 }
 0x45b   :  { %1784 = vrot.lane.b32.xlu1 %v1783_v47, %s1877_s25  ;;  %v1751_v48 = vunpack.i.l.bf16 %v2571_v62 }
 0x45c   :  { %v968_v12 = vsel %vm421_vm8, %v1712_v34, %v1716_v14  ;;  %v969_v9 = vsel %vm421_vm8, %v1716_v14, %v1717_v21  ;;  %v1045_v14 = vsel %vm515_vm11, %v1761_v20, %v1762_v35 }
 0x45d   :  { %v2583_v63 = vpop.permute.xlu0 %1053  ;;  %v1720_v24 = vpop.permute.xlu1 %1719  ;;  %v1029_v41 = vsel %vm495_vm10, %v1751_v48, %v1752_v36 }
 0x45e   :  { %v1722_v17 = vunpack.i.h.bf16 %v1720_v24  ;;  %v1721_v22 = vunpack.i.l.bf16 %v1720_v24  ;;  %1148 = vrot.lane.b32.xlu0 %v2583_v63, %s1877_s25 }
 0x460   :  { %v983_v37 = vsel %vm114_vm0, %v1721_v22, %v1722_v17  ;;  %v982_v29 = vsel %vm114_vm0, %v2776_v4, %v1721_v22 }
 0x461   :  { %v1793_v60 = vpack.i.bf16 %v983_v37, %v968_v12  ;;  %v1725_v44 = vpop.permute.xlu1 %1724  ;;  %v1803_v45 = vpack.i.bf16 %v969_v9, %v982_v29  ;;  %v2779_v12 = vld [vmem:[#allocation6_spill] sm:$0xff] }
 0x462   :  { %v1726_v28 = vunpack.i.l.bf16 %v1725_v44  ;;  %1779 = vrot.lane.b32.xlu0 %v1778_v26, %s1877_s25  ;;  %v1727_v31 = vunpack.i.h.bf16 %v1725_v44  ;;  %v2778_v26 = vld [vmem:[#allocation8_spill] sm:$0xff] }
 0x463   :  { %1794 = vrot.lane.b32.xlu1 %v1793_v60, %s1877_s25  ;;  %v1058_v60 = vpop.permute.xlu0 %1057 }
 0x464   :  { %v984_v43 = vsel %vm114_vm0, %v1722_v17, %v1726_v28  ;;  %v1813_v58 = vpack.i.bf16 %v998_v23, %v1727_v31  ;;  %v985_v10 = vsel %vm114_vm0, %v1726_v28, %v1727_v31 }
 0x465   :  { %v1735_v61 = vpop.permute.xlu1 %1734  ;;  %v1798_v19 = vpack.i.bf16 %v966_v46, %v984_v43  ;;  %v1808_v5 = vpack.i.bf16 %v985_v10, %v1717_v21 }
 0x466   :  { %1789 = vrot.lane.b32.xlu0 %v1788_v11, %s1877_s25  ;;  %v1736_v3 = vunpack.i.l.bf16 %v1735_v61  ;;  %v1737_v1 = vunpack.i.h.bf16 %v1735_v61 }
 0x467   :  { %1804 = vrot.lane.b32.xlu1 %v1803_v45, %s1877_s25  ;;  %v1770_v11 = vpop.permute.xlu0 %1769 }
 0x468   :  { %v999_v8 = vsel %vm75_vm7, %v1732_v27, %v1736_v3  ;;  %v1000_v16 = vsel %vm75_vm7, %v1736_v3, %v1737_v1  ;;  %v2780_v27 = vld [vmem:[#allocation9_spill] sm:$0xff]  ;;  %v1772_v9 = vunpack.i.h.bf16 %v1770_v11  ;;  %v1771_v45 = vunpack.i.l.bf16 %v1770_v11 }
 0x469   :  { %v1745_v42 = vpop.permute.xlu1 %1744  ;;  %v1818_v2 = vpack.i.bf16 %v1013_v18, %v999_v8  ;;  %v1828_v56 = vpack.i.bf16 %v1000_v16, %v1741_v32 }
 0x46a   :  { %v1747_v59 = vunpack.i.h.bf16 %v1745_v42  ;;  %v1746_v0 = vunpack.i.l.bf16 %v1745_v42  ;;  %1799 = vrot.lane.b32.xlu0 %v1798_v19, %s1877_s25  ;;  %v1159_v33 = vsel %vm373_vm6, %v1771_v45, %v1772_v9 }
 0x46b   :  { %1814 = vrot.lane.b32.xlu1 %v1813_v58, %s1877_s25 }
 0x46c   :  { %v1014_v38 = vsel %vm475_vm9, %v1742_v53, %v1746_v0  ;;  %v1015_v6 = vsel %vm475_vm9, %v1746_v0, %v1747_v59  ;;  %v1016_v50 = vsel %vm475_vm9, %v1747_v59, %v2291_v25  ;;  %v2781_v53 = vld [vmem:[#allocation10_spill] sm:$0xff] }
 0x46d   :  { %v1823_v54 = vpack.i.bf16 %v1731_v57, %v1014_v38  ;;  %v1755_v55 = vpop.permute.xlu1 %1754  ;;  %v1833_v51 = vpack.i.bf16 %v1015_v6, %v1737_v1  ;;  %v1838_v24 = vpack.i.bf16 %v1029_v41, %v1016_v50  ;;  %v2782_v59 = vunpack.i.l.bf16 %v2781_v53 }
 0x46e   :  { %v1756_v52 = vunpack.i.l.bf16 %v1755_v55  ;;  %1809 = vrot.lane.b32.xlu0 %v1808_v5, %s1877_s25  ;;  %v1757_v40 = vunpack.i.h.bf16 %v1755_v55 }
 0x46f   :  { %1824 = vrot.lane.b32.xlu1 %v1823_v54, %s1877_s25  ;;  %v1158_v0 = vsel %vm373_vm6, %v2782_v59, %v1771_v45 }
 0x470   :  { %v1030_v7 = vsel %vm495_vm10, %v1752_v36, %v1756_v52  ;;  %v1031_v34 = vsel %vm495_vm10, %v1756_v52, %v1757_v40  ;;  %v1032_v37 = vsel %vm495_vm10, %v1757_v40, %v2779_v12 }
 0x471   :  { %v1765_v47 = vpop.permute.xlu1 %1764  ;;  %v1843_v15 = vpack.i.bf16 %v1045_v14, %v1030_v7  ;;  %v1853_v62 = vpack.i.bf16 %v1031_v34, %v1761_v20 }
 0x472   :  { %1819 = vrot.lane.b32.xlu0 %v1818_v2, %s1877_s25  ;;  %v1766_v13 = vunpack.i.l.bf16 %v1765_v47  ;;  %v1767_v49 = vunpack.i.h.bf16 %v1765_v47 }
 0x473   :  { %1834 = vrot.lane.b32.xlu1 %v1833_v51, %s1877_s25 }
 0x474   :  { %v1046_v39 = vsel %vm515_vm11, %v1762_v35, %v1766_v13  ;;  %v1047_v17 = vsel %vm515_vm11, %v1766_v13, %v1767_v49  ;;  %v1048_v21 = vsel %vm515_vm11, %v1767_v49, %v2778_v26 }
 0x475   :  { %v1848_v25 = vpack.i.bf16 %v1751_v48, %v1046_v39  ;;  %v1056_v22 = vpop.permute.xlu1 %1055  ;;  %v1858_v30 = vpack.i.bf16 %v1047_v17, %v1032_v37 }
 0x476   :  { %1829 = vrot.lane.b32.xlu0 %v1828_v56, %s1877_s25  ;;  %v1062_v44 = vsel %vm535_vm12, %v1056_v22, %v1058_v60  ;;  %v1061_v29 = vsel %vm535_vm12, %v2583_v63, %v1056_v22 }
 0x477   :  { %1844 = vrot.lane.b32.xlu1 %v1843_v15, %s1877_s25 }
 0x479   :  { %v1060_v4 = vpop.permute.xlu1 %1059 }
 0x47a   :  { %1839 = vrot.lane.b32.xlu0 %v1838_v24, %s1877_s25  ;;  %v1063_v28 = vsel %vm535_vm12, %v1058_v60, %v1060_v4  ;;  %v1064_v57 = vsel %vm535_vm12, %v1060_v4, %v2780_v27 }
 0x47b   :  { %1854 = vrot.lane.b32.xlu1 %v1853_v62, %s1877_s25 }
 0x47e   :  { %1849 = vrot.lane.b32.xlu0 %v1848_v25, %s1877_s25 }
 0x47f   :  { %1146 = vrot.lane.b32.xlu1 %v1048_v21, %s1877_s25 }
 0x482   :  { %1859 = vrot.lane.b32.xlu0 %v1858_v30, %s1877_s25 }
 0x483   :  { %1152 = vrot.lane.b32.xlu1 %v1062_v44, %s1877_s25 }
 0x486   :  { %1150 = vrot.lane.b32.xlu0 %v1061_v29, %s1877_s25 }
 0x487   :  { %1154 = vrot.lane.b32.xlu1 %v1063_v28, %s1877_s25 }
 0x48a   :  { %1156 = vrot.lane.b32.xlu0 %v1064_v57, %s1877_s25 }
 0x4c9   :  { %v1775_v31 = vpop.permute.xlu1 %1774 }
 0x4ca   :  { %v1777_v43 = vunpack.i.h.bf16 %v1775_v31  ;;  %v1776_v61 = vunpack.i.l.bf16 %v1775_v31 }
 0x4cc   :  { %v1163_v63 = vsel %vm373_vm6, %v1776_v61, %v1777_v43 }
 0x4cd   :  { %v1479_v46 = vpack.c.bf16 %v1163_v63, %v1159_v33  ;;  %v1785_v19 = vpop.permute.xlu1 %1784 }
 0x4ce   :  { %v1787_v5 = vunpack.i.h.bf16 %v1785_v19  ;;  %v1786_v8 = vunpack.i.l.bf16 %v1785_v19 }
 0x4cf   :  { %1480 = vmatprep.subr.bf16.mxu0 %v1479_v46 }
 0x4d0   :  { %v2656_v23 = vpop.permute.xlu0 %1148  ;;  %v1164_v20 = vsel %vm373_vm6, %v1777_v43, %v1787_v5 }
 0x4d4   :  { %v1780_v58 = vpop.permute.xlu0 %1779 }
 0x4d5   :  { %v1781_v10 = vunpack.i.l.bf16 %v1780_v58  ;;  %v1795_v3 = vpop.permute.xlu1 %1794  ;;  %v1782_v42 = vunpack.i.h.bf16 %v1780_v58 }
 0x4d6   :  { %v1797_v2 = vunpack.i.h.bf16 %v1795_v3  ;;  %v1796_v7 = vunpack.i.l.bf16 %v1795_v3 }
 0x4d7   :  { %v1162_v32 = vsel %vm373_vm6, %v1781_v10, %v1776_v61  ;;  %v1160_v6 = vsel %vm373_vm6, %v1772_v9, %v1782_v42  ;;  %v1161_v36 = vsel %vm373_vm6, %v1782_v42, %v1786_v8 }
 0x4d8   :  { %v1481_v38 = vpack.c.bf16 %v1162_v32, %v1158_v0  ;;  %v1790_v1 = vpop.permute.xlu0 %1789  ;;  %v1497_v40 = vpack.c.bf16 %v1164_v20, %v1160_v6 }
 0x4d9   :  { %v1791_v54 = vunpack.i.l.bf16 %v1790_v1  ;;  %v1805_v55 = vpop.permute.xlu1 %1804  ;;  %v1792_v52 = vunpack.i.h.bf16 %v1790_v1 }
 0x4da   :  { %1482 = vmatpush1.bf16.msra.mxu0 %v1481_v38  ;;  %v1806_v18 = vunpack.i.l.bf16 %v1805_v55  ;;  %v1807_v56 = vunpack.i.h.bf16 %v1805_v55 }
 0x4db   :  { %v1165_v35 = vsel %vm373_vm6, %v1787_v5, %v1791_v54  ;;  %v1167_v13 = vsel %vm373_vm6, %v1792_v52, %v1796_v7 }
 0x4dc   :  { %v1800_v16 = vpop.permute.xlu0 %1799  ;;  %v1495_v51 = vpack.c.bf16 %v1165_v35, %v1161_v36  ;;  %v1170_v50 = vsel %vm373_vm6, %v1806_v18, %v1797_v2  ;;  %v1168_v22 = vsel %vm373_vm6, %v1796_v7, %v1807_v56 }
 0x4dd   :  { %v1802_v47 = vunpack.i.h.bf16 %v1800_v16  ;;  %v1801_v48 = vunpack.i.l.bf16 %v1800_v16  ;;  %v1815_v14 = vpop.permute.xlu1 %1814 }
 0x4de   :  { %1496 = vmatprep.subr.bf16.mxu1 %v1495_v51  ;;  %v1816_v49 = vunpack.i.l.bf16 %v1815_v14  ;;  %v1817_v44 = vunpack.i.h.bf16 %v1815_v14 }
 0x4df   :  { %v1166_v15 = vsel %vm373_vm6, %v1802_v47, %v1792_v52  ;;  %1498 = vmatpush1.bf16.msra.mxu1 %v1497_v40  ;;  %v1171_v34 = vsel %vm373_vm6, %v1797_v2, %v1801_v48 }
 0x4e0   :  { %v1485_v41 = vpack.c.bf16 %v1170_v50, %v1166_v15  ;;  %v1810_v24 = vpop.permute.xlu0 %1809  ;;  %v1483_v62 = vpack.c.bf16 %v1171_v34, %v1167_v13 }
 0x4e1   :  { %v1812_v39 = vunpack.i.h.bf16 %v1810_v24  ;;  %v1811_v25 = vunpack.i.l.bf16 %v1810_v24  ;;  %v1825_v17 = vpop.permute.xlu1 %1824 }
 0x4e2   :  { %1484 = vmatprep.subr.bf16.mxu0 %v1483_v62  ;;  %v1826_v4 = vunpack.i.l.bf16 %v1825_v17  ;;  %v1827_v57 = vunpack.i.h.bf16 %v1825_v17  ;;  %v1065_v17 = vld [vmem:[%s2735_s3] sm:$0xff] }
 0x4e3   :  { %v1172_v26 = vsel %vm373_vm6, %v1801_v48, %v1812_v39  ;;  %1486 = vmatpush1.bf16.msra.mxu0 %v1485_v41  ;;  %v1169_v21 = vsel %vm373_vm6, %v1807_v56, %v1811_v25  ;;  %v1173_v12 = vsel %vm373_vm6, %v1812_v39, %v1816_v49 }
 0x4e4   :  { %v1501_v37 = vpack.c.bf16 %v1172_v26, %v1168_v22  ;;  %v1820_v30 = vpop.permute.xlu0 %1819  ;;  %v1499_v60 = vpack.c.bf16 %v1173_v12, %v1169_v21  ;;  %v1174_v63 = vsel %vm373_vm6, %v1827_v57, %v1817_v44 }
 0x4e5   :  { %v1822_v29 = vunpack.i.h.bf16 %v1820_v30  ;;  %v1821_v28 = vunpack.i.l.bf16 %v1820_v30  ;;  %v1835_v27 = vpop.permute.xlu1 %1834 }
 0x4e6   :  { %1500 = vmatprep.subr.bf16.mxu1 %v1499_v60  ;;  %v1837_v19 = vunpack.i.h.bf16 %v1835_v27  ;;  %v1836_v3 = vunpack.i.l.bf16 %v1835_v27 }
 0x4e7   :  { %1502 = vmatpush1.bf16.msra.mxu1 %v1501_v37  ;;  %v1175_v11 = vsel %vm373_vm6, %v1817_v44, %v1821_v28  ;;  %v1179_v9 = vsel %vm373_vm6, %v1822_v29, %v1826_v4 }
 0x4e8   :  { %v1830_v45 = vpop.permute.xlu0 %1829  ;;  %v1487_v31 = vpack.c.bf16 %v1179_v9, %v1175_v11  ;;  %v1180_v1 = vsel %vm373_vm6, %v1826_v4, %v1837_v19 }
 0x4e9   :  { %v1831_v43 = vunpack.i.l.bf16 %v1830_v45  ;;  %v1845_v61 = vpop.permute.xlu1 %1844  ;;  %v1832_v33 = vunpack.i.h.bf16 %v1830_v45 }
 0x4ea   :  { %1488 = vmatprep.subr.bf16.mxu0 %v1487_v31  ;;  %v1847_v8 = vunpack.i.h.bf16 %v1845_v61  ;;  %v1846_v52 = vunpack.i.l.bf16 %v1845_v61 }
 0x4eb   :  { %v1178_v46 = vsel %vm373_vm6, %v1831_v43, %v1822_v29  ;;  %v1176_v59 = vsel %vm373_vm6, %v1821_v28, %v1832_v33  ;;  %v1177_v5 = vsel %vm373_vm6, %v1832_v33, %v1836_v3  ;;  %v1375_v3 = vld [vmem:[%s2736_s6] sm:$0xff] }
 0x4ec   :  { %v1489_v58 = vpack.c.bf16 %v1178_v46, %v1174_v63  ;;  %v1840_v10 = vpop.permute.xlu0 %1839  ;;  %v1505_v6 = vpack.c.bf16 %v1180_v1, %v1176_v59  ;;  %v1376_v59 = vld [vmem:[%s2737_s7] sm:$0xff] }
 0x4ed   :  { %v1841_v42 = vunpack.i.l.bf16 %v1840_v10  ;;  %v1855_v53 = vpop.permute.xlu1 %1854  ;;  %v1842_v0 = vunpack.i.h.bf16 %v1840_v10 }
 0x4ee   :  { %1490 = vmatpush1.bf16.msra.mxu0 %v1489_v58  ;;  %v1856_v32 = vunpack.i.l.bf16 %v1855_v53  ;;  %v1857_v20 = vunpack.i.h.bf16 %v1855_v53 }
 0x4ef   :  { %v1181_v38 = vsel %vm373_vm6, %v1837_v19, %v1841_v42  ;;  %v1183_v51 = vsel %vm373_vm6, %v1842_v0, %v1846_v52 }
 0x4f0   :  { %v1850_v54 = vpop.permute.xlu0 %1849  ;;  %v1503_v55 = vpack.c.bf16 %v1181_v38, %v1177_v5  ;;  %v1186_v2 = vsel %vm373_vm6, %v1856_v32, %v1847_v8  ;;  %v1184_v15 = vsel %vm373_vm6, %v1846_v52, %v1857_v20 }
 0x4f1   :  { %v1852_v18 = vunpack.i.h.bf16 %v1850_v54  ;;  %v1851_v36 = vunpack.i.l.bf16 %v1850_v54  ;;  %v1147_v35 = vpop.permute.xlu1 %1146 }
 0x4f2   :  { %1504 = vmatprep.subr.bf16.mxu1 %v1503_v55 }
 0x4f3   :  { %v1182_v16 = vsel %vm373_vm6, %v1852_v18, %v1842_v0  ;;  %1506 = vmatpush1.bf16.msra.mxu1 %v1505_v6  ;;  %v1187_v40 = vsel %vm373_vm6, %v1847_v8, %v1851_v36 }
 0x4f4   :  { %v1493_v7 = vpack.c.bf16 %v1186_v2, %v1182_v16  ;;  %v1860_v47 = vpop.permute.xlu0 %1859  ;;  %v1491_v48 = vpack.c.bf16 %v1187_v40, %v1183_v51  ;;  %v1868_v2 = vld [vmem:[%s2731_s0 + $0x8] sm:$0xff]  ;;  %v1869_v51 = vld [vmem:[%s2731_s0 + $0x10] sm:$0xff] }
 0x4f5   :  { %v1862_v14 = vunpack.i.h.bf16 %v1860_v47  ;;  %v1861_v56 = vunpack.i.l.bf16 %v1860_v47  ;;  %v1153_v50 = vpop.permute.xlu1 %1152 }
 0x4f6   :  { %1492 = vmatprep.subr.bf16.mxu0 %v1491_v48 }
 0x4f7   :  { %v1188_v13 = vsel %vm373_vm6, %v1851_v36, %v1862_v14  ;;  %1494 = vmatpush1.bf16.msra.mxu0 %v1493_v7  ;;  %v1185_v34 = vsel %vm373_vm6, %v1857_v20, %v1861_v56  ;;  %v1189_v41 = vsel %vm373_vm6, %v1862_v14, %v1147_v35  ;;  %v1867_v35 = vld [vmem:[%s2731_s0] sm:$0xff]  ;;  %v1870_v7 = vld [vmem:[%s2731_s0 + $0x18] sm:$0xff] }
 0x4f8   :  { %v1509_v24 = vpack.c.bf16 %v1188_v13, %v1184_v15  ;;  %v1151_v62 = vpop.permute.xlu0 %1150  ;;  %v1507_v49 = vpack.c.bf16 %v1189_v41, %v1185_v34 }
 0x4f9   :  { %v1190_v39 = vsel %vm373_vm6, %v2656_v23, %v1151_v62  ;;  %v1191_v25 = vsel %vm373_vm6, %v1151_v62, %v1153_v50  ;;  %v1155_v22 = vpop.permute.xlu1 %1154 }
 0x4fa   :  { %1249 = vmatprep.subr.mxu0 %v1191_v25  ;;  %1508 = vmatprep.subr.bf16.mxu1 %v1507_v49  ;;  %v1192_v12 = vsel %vm373_vm6, %v1153_v50, %v1155_v22 }
 0x4fb   :  { %1250 = vmatpush1.msra.mxu0 %v1190_v39  ;;  %1510 = vmatpush1.bf16.msra.mxu1 %v1509_v24 }
 0x4fc   :  { %v1157_v26 = vpop.permute.xlu0 %1156  ;;  %1445 = vmatmul.mubr.msk.f32.vlgmr.msra.gmra.mrb[2].mxu0 %vm708_vm13, %v1065_v17 }
 0x4fd   :  { %v1193_v21 = vsel %vm373_vm6, %v1155_v22, %v1157_v26 }
 0x4fe   :  { %1320 = vmatprep.subr.mxu1 %v1193_v21 }
 0x4ff   :  { %1321 = vmatpush1.msra.mxu1 %v1192_v12 }
 0x500   :  { %1446 = vmatmul.mubr.msk.f32.vlgmr.msra.gmra.mrb[2].mxu1 %vm708_vm13, %v1065_v17 }
 0x5cf   :  { %v1299_v23 = vpop.f32.mrb[2].mxu0 }
 0x5d0   :  { %v1383_v37 = vmul.f32 %v1299_v23, %v1299_v23  ;;  %v1301_v30 = vpop.f32.mrb[3].mxu0 }
 0x5d1   :  { %v1377_v60 = vadd.f32 %v1301_v30, %v1299_v23  ;;  %v1384_v44 = vmul.f32 %v1301_v30, %v1301_v30 }
 0x5d3   :  { %v1387_v4 = vadd.f32 %v1384_v44, %v1383_v37  ;;  %v1370_v29 = vpop.f32.mrb[2].mxu1 }
 0x5d4   :  { %v1378_v28 = vadd.f32 %v1377_v60, %v1370_v29  ;;  %v1385_v27 = vmul.f32 %v1370_v29, %v1370_v29  ;;  %v1372_v57 = vpop.f32.mrb[3].mxu1 }
 0x5d5   :  { %v1386_v11 = vmul.f32 %v1372_v57, %v1372_v57 }
 0x5d6   :  { %v1388_v9 = vadd.f32 %v1387_v4, %v1385_v27  ;;  %v1379_v45 = vadd.f32 %v1378_v28, %v1372_v57 }
 0x5d8   :  { %v1389_v31 = vadd.f32 %v1388_v9, %v1386_v11  ;;  %1380 = vadd.xlane.f32.xlu1 %v1379_v45 }
 0x5da   :  { %1390 = vadd.xlane.f32.xlu0 %v1389_v31 }
 0x665   :  { %v1381_v43 = vpop.xlane.xlu1 %1380 }
 0x666   :  { %v1382_v61 = vmul.f32 0.001953125, %v1381_v43 }
 0x667   :  { %v1391_v33 = vpop.xlane.xlu0 %1390 }
 0x668   :  { %v1393_v63 = vmul.f32 %v1382_v61, %v1382_v61  ;;  %v1392_v46 = vmul.f32 0.001953125, %v1391_v33 }
 0x66a   :  { %v1394_v19 = vsub.f32 %v1392_v46, %v1393_v63 }
 0x66c   :  { %v1395_v58 = vmax.f32 %v1394_v19, 0.0 }
 0x66e   :  { %v1396_v10 = vadd.f32 1e-05, %v1395_v58 }
 0x670   :  { %1865 = vrsqrt.f32 %v1396_v10 }
 0x67a   :  { %v1866_v42 = vpop.eup %1865 }
 0x67b   :  { %v1398_v53 = vmul.f32 %v1866_v42, %v1375_v3 }
 0x67d   :  { %1403 = vperm.xlu0 %1696, %v1398_v53   ;;  %v1399_v0 = vmul.f32 %v1398_v53, %v1382_v61 }
 0x67f   :  { %v1400_v32 = vsub.f32 %v1376_v59, %v1399_v0 }
 0x681   :  { %1412 = vperm.xlu1 %1697, %v1400_v32  }
 0x6fc   :  { %v1404_v5 = vpop.permute.xlu0 %1403 }
 0x6fd   :  { %v1406_v38 = vmul.f32 %v1404_v5, %v1299_v23  ;;  %v1407_v1 = vmul.f32 %v1404_v5, %v1301_v30  ;;  %v1408_v8 = vmul.f32 %v1404_v5, %v1370_v29  ;;  %v1409_v54 = vmul.f32 %v1404_v5, %v1372_v57 }
 0x700   :  { %v1413_v55 = vpop.permute.xlu1 %1412 }
 0x701   :  { %v1415_v6 = vadd.f32 %v1413_v55, %v1406_v38  ;;  %v1416_v52 = vadd.f32 %v1413_v55, %v1407_v1  ;;  %v1417_v18 = vadd.f32 %v1413_v55, %v1408_v8  ;;  %v1418_v36 = vadd.f32 %v1413_v55, %v1409_v54 }
 0x703   :  { %v1419_v20 = vadd.f32 %v1867_v35, %v1415_v6  ;;  %v1420_v16 = vadd.f32 %v1868_v2, %v1416_v52  ;;  %v1421_v40 = vadd.f32 %v1869_v51, %v1417_v18  ;;  %v1422_v47 = vadd.f32 %v1870_v7, %v1418_v36 }
 0x705   :  { %v1423_v48 = vmax.f32 %v1419_v20, 0.0  ;;  %v1424_v14 = vmax.f32 %v1420_v16, 0.0  ;;  %v1425_v56 = vmax.f32 %v1421_v40, 0.0  ;;  %v1426_v50 = vmax.f32 %v1422_v47, 0.0 }
 0x707   :  { %1427 = vst [vmem:[%s2738_s8] sm:$0xff] %v1423_v48  ;;  %1428 = vst [vmem:[%s2738_s8 + $0x8] sm:$0xff] %v1424_v14 }
 0x708   :  { %1429 = vst [vmem:[%s2738_s8 + $0x10] sm:$0xff] %v1425_v56  ;;  %1430 = vst [vmem:[%s2738_s8 + $0x18] sm:$0xff] %v1426_v50 }

</bundles_post_ra>
